<compile_context>
chip_gen: v6e
topology: v6e:2x2x1
jax: 0.10.0
libtpu: 0.0.40
codegen_flags: <defaults>
</compile_context>

<pallas_src>
import itertools
from functools import partial

import numpy as np
import jax
import jax.numpy as jnp
from jax.experimental import pallas as pl
from jax.experimental.pallas import tpu as pltpu


def _make_kernel(rel_counts, batch, hidden):
    """Build the single-step fused TRN kernel (all sizes static at trace time)."""
    S = len(rel_counts)
    H = hidden
    B = batch

    def kernel(x_ref,      # VMEM (S, M_pad, T*D) bf16  grouped relu'd relation inputs
               w1_ref,     # VMEM (S, T*D, H)     bf16  zero-padded per-scale W1
               b1_ref,     # VMEM (S, 1, H)       f32
               w2_ref,     # VMEM (S*H, C)        f32   K-concatenated W2
               b2_ref,     # VMEM (1, C)          f32   pre-summed layer-2 bias
               o_ref,      # VMEM (B, C)          f32
               hcat_ref):  # scratch VMEM (B, S*H) f32  lane-dense hidden slab
        # Static unroll over scales (S is small, e.g. 7).
        for s in range(S):
            # One batched layer-1 matmul per scale: all sampled relations of this
            # scale share the pushed W1_s weights.  Padded frame slots are killed
            # by the zero-padded W1 rows; padded relation rows are never summed.
            h = jnp.dot(x_ref[s], w1_ref[s],
                        preferred_element_type=jnp.float32)        # (M_pad, H)
            h = jnp.maximum(h + b1_ref[s], 0.0)
            acc = h[0:B]                                            # relation 0
            for j in range(1, rel_counts[s]):                       # static unroll
                acc = acc + h[j * B:(j + 1) * B]
            hcat_ref[:, s * H:(s + 1) * H] = acc                    # (B, H) slice

        # Fused layer 2: one (B, S*H) x (S*H, C) dot + pre-folded bias.
        o_ref[...] = (jnp.dot(hcat_ref[...], w2_ref[...],
                              preferred_element_type=jnp.float32)
                      + b2_ref[...])

    return kernel


@partial(jax.jit, static_argnames=("rel_counts",))
def _trn_forward(x, frame_tbl, w1, b1, w2_cat, b2_total, *, rel_counts):
    """x: (B, T, D) f32; frame_tbl: (S, NSLOT, T) i32 (padded with frame 0)."""
    B, T, D = x.shape
    S, NSLOT, _ = frame_tbl.shape
    H = w1.shape[-1]
    C = w2_cat.shape[-1]
    TD = T * D

    # ReLU once + bf16 cast BEFORE the gather, then a single XLA gather.
    x_bf = jnp.maximum(x, 0.0).astype(jnp.bfloat16)
    g = jnp.take(x_bf, frame_tbl.reshape(-1), axis=1)         # (B, S*NSLOT*T, D)
    g = g.reshape(B, S * NSLOT, TD).transpose(1, 0, 2)        # (S*NSLOT, B, TD)
    x_grp = g.reshape(S, NSLOT * B, TD)                       # relation-major, batch-minor

    # Pad the grouped layer-1 M dimension to a full sublane tile (multiple of 8).
    M = NSLOT * B
    M_pad = ((M + 7) // 8) * 8
    if M_pad != M:
        x_grp = jnp.pad(x_grp, ((0, 0), (0, M_pad - M), (0, 0)))

    kernel = _make_kernel(rel_counts, B, H)
    return pl.pallas_call(
        kernel,
        out_shape=jax.ShapeDtypeStruct((B, C), jnp.float32),
        in_specs=[pl.BlockSpec(memory_space=pltpu.MemorySpace.VMEM)] * 5,
        out_specs=pl.BlockSpec(memory_space=pltpu.MemorySpace.VMEM),
        scratch_shapes=[pltpu.VMEM((B, S * H), jnp.float32)],
    )(x_grp, w1, b1, w2_cat, b2_total)


class RelationModuleMultiScaleJAX:
    NUM_BOTTLENECK = 256
    SUBSAMPLE_NUM = 3

    def __init__(self, img_feature_dim, num_frames, num_class, key):
        self.img_feature_dim = img_feature_dim
        self.num_frames = num_frames
        self.num_class = num_class
        self.scales = list(range(num_frames, 1, -1))
        self.relations_scales = [
            list(itertools.combinations(range(num_frames), s)) for s in self.scales
        ]
        self.subsample_scales = [
            min(self.SUBSAMPLE_NUM, len(r)) for r in self.relations_scales
        ]
        # Relations of each scale contributing per forward (scale 0 -> exactly 1).
        self.rel_counts = tuple([1] + self.subsample_scales[1:])
        self.max_rel = max(self.rel_counts)

        S = len(self.scales)
        H = self.NUM_BOTTLENECK
        T, D, C = num_frames, img_feature_dim, num_class
        TD = T * D

        # Zero-padded / packed parameters (PyTorch-Linear-like uniform init).
        w1 = np.zeros((S, TD, H), np.float32)        # rows >= scale*D stay exactly zero
        b1 = np.zeros((S, 1, H), np.float32)
        w2_cat = np.zeros((S * H, C), np.float32)    # K-concatenated layer-2 weights
        b2_total = np.zeros((1, C), np.float32)      # sum_s n_s * b2_s
        for sidx, scale in enumerate(self.scales):
            in_dim = scale * D
            key, k1, k2, k3, k4 = jax.random.split(key, 5)
            bnd1 = 1.0 / np.sqrt(in_dim)
            w1[sidx, :in_dim, :] = np.asarray(
                jax.random.uniform(k1, (in_dim, H), jnp.float32, -bnd1, bnd1))
            b1[sidx, 0, :] = np.asarray(
                jax.random.uniform(k2, (H,), jnp.float32, -bnd1, bnd1))
            bnd2 = 1.0 / np.sqrt(H)
            w2_cat[sidx * H:(sidx + 1) * H, :] = np.asarray(
                jax.random.uniform(k3, (H, C), jnp.float32, -bnd2, bnd2))
            b2 = np.asarray(jax.random.uniform(k4, (C,), jnp.float32, -bnd2, bnd2))
            b2_total[0] += self.rel_counts[sidx] * b2

        self.w1 = jnp.asarray(w1).astype(jnp.bfloat16)   # largest operand -> bf16 into MXU
        self.b1 = jnp.asarray(b1)
        self.w2_cat = jnp.asarray(w2_cat)
        self.b2_total = jnp.asarray(b2_total)

    def _sample_relation_tables(self):
        """Host-side relation subsampling (matches np.random.choice in PyTorch).

        Returns an (S, max_rel, T) int32 table; unused relation slots and unused
        frame positions are padded with 0 (the zero W1 rows / unselected-row sums
        make the padding inert).
        """
        T = self.num_frames
        S = len(self.scales)
        tbl = np.zeros((S, self.max_rel, T), np.int32)
        tbl[0, 0, :self.scales[0]] = self.relations_scales[0][0]
        for sidx in range(1, S):
            choice = np.random.choice(len(self.relations_scales[sidx]),
                                      self.subsample_scales[sidx], replace=False)
            for j, i in enumerate(choice):
                rel = self.relations_scales[sidx][i]
                tbl[sidx, j, :len(rel)] = rel
        return tbl

    def forward(self, x, frame_tbl=None):
        if frame_tbl is None:
            frame_tbl = self._sample_relation_tables()
        return _trn_forward(x, jnp.asarray(frame_tbl), self.w1, self.b1,
                            self.w2_cat, self.b2_total, rel_counts=self.rel_counts)


if __name__ == "__main__":
    np.random.seed(0)                    # deterministic relation subsampling
    key = jax.random.PRNGKey(0)
    k_param, k_input = jax.random.split(key)

    B, T, D, C = 2, 8, 32, 4
    module = RelationModuleMultiScaleJAX(img_feature_dim=D, num_frames=T,
                                         num_class=C, key=k_param)
    x = jax.random.normal(k_input, (B, T, D), dtype=jnp.float32)

    # Sample once so the fused kernel and the reference see the same relations.
    frame_tbl = module._sample_relation_tables()
    out = jax.block_until_ready(module.forward(x, frame_tbl))
    assert out.shape == (B, C) and out.dtype == jnp.float32

    # Pure-JAX reference (same sampled relations, same padded weights).
    H = module.NUM_BOTTLENECK
    w1f = module.w1.astype(jnp.float32)
    x_relu = jnp.maximum(x, 0.0)
    ref = jnp.zeros((B, C), jnp.float32)
    for s in range(len(module.scales)):
        for j in range(module.rel_counts[s]):
            xr = x_relu[:, frame_tbl[s, j], :].reshape(B, T * D)
            h = jnp.maximum(xr @ w1f[s] + module.b1[s], 0.0)
            ref = ref + h @ module.w2_cat[s * H:(s + 1) * H]
    ref = ref + module.b2_total

    np.testing.assert_allclose(np.asarray(out), np.asarray(ref),
                               rtol=5e-2, atol=5e-2)
    print("KERNEL_OK")
</pallas_src>

<mosaic_0001>
module attributes {stable_mosaic.version = 11 : i64} {
  func.func @kernel(%arg0: memref<7x8x256xbf16, #tpu.memory_space<vmem>>, %arg1: memref<7x256x256xbf16, #tpu.memory_space<vmem>>, %arg2: memref<7x1x256xf32, #tpu.memory_space<vmem>>, %arg3: memref<1792x4xf32, #tpu.memory_space<vmem>>, %arg4: memref<1x4xf32, #tpu.memory_space<vmem>>, %arg5: memref<2x4xf32, #tpu.memory_space<vmem>>, %arg6: memref<2x1792xf32, #tpu.memory_space<vmem>>) attributes {dimension_semantics = [], scalar_prefetch = 0 : i64, scratch_operands = 1 : i64, tpu.core_type = #tpu.core_type<tc>} {
    %c0 = arith.constant 0 : index
    %c0_0 = arith.constant 0 : index
    %c0_1 = arith.constant 0 : index
    %0 = vector.load %arg0[%c0, %c0_0, %c0_1] : memref<7x8x256xbf16, #tpu.memory_space<vmem>>, vector<1x8x256xbf16>
    %1 = vector.shape_cast %0 : vector<1x8x256xbf16> to vector<8x256xbf16>
    %c0_2 = arith.constant 0 : index
    %c0_3 = arith.constant 0 : index
    %c0_4 = arith.constant 0 : index
    %2 = vector.load %arg1[%c0_2, %c0_3, %c0_4] : memref<7x256x256xbf16, #tpu.memory_space<vmem>>, vector<1x256x256xbf16>
    %3 = vector.shape_cast %2 : vector<1x256x256xbf16> to vector<256x256xbf16>
    %cst = arith.constant dense<0.000000e+00> : vector<8x256xf32>
    %4 = tpu.matmul %1, %3, %cst {dimension_numbers = #tpu.dot_dimension_numbers<[1], [0], [0], [1], [0, 0, 1, 1], [], []>} : vector<8x256xbf16>, vector<256x256xbf16>, vector<8x256xf32> -> vector<8x256xf32>
    %c0_5 = arith.constant 0 : index
    %c0_6 = arith.constant 0 : index
    %c0_7 = arith.constant 0 : index
    %5 = vector.load %arg2[%c0_5, %c0_6, %c0_7] : memref<7x1x256xf32, #tpu.memory_space<vmem>>, vector<1x1x256xf32>
    %6 = vector.shape_cast %5 : vector<1x1x256xf32> to vector<1x256xf32>
    %7 = vector.broadcast %6 : vector<1x256xf32> to vector<8x256xf32>
    %8 = arith.addf %4, %7 : vector<8x256xf32>
    %cst_8 = arith.constant 0.000000e+00 : f32
    %9 = vector.broadcast %cst_8 : f32 to vector<8x256xf32>
    %10 = arith.maximumf %8, %9 : vector<8x256xf32>
    %11 = vector.extract_strided_slice %10 {offsets = [0, 0], sizes = [2, 256], strides = [1, 1]} : vector<8x256xf32> to vector<2x256xf32>
    %c0_9 = arith.constant 0 : index
    %c0_10 = arith.constant 0 : index
    %12 = vector.load %arg6[%c0_9, %c0_10] : memref<2x1792xf32, #tpu.memory_space<vmem>>, vector<2x256xf32>
    tpu.vector_store %arg6[%c0_9, %c0_10], %11 {strides = array<i32>} : memref<2x1792xf32, #tpu.memory_space<vmem>>, vector<2x256xf32>,
    %c1 = arith.constant 1 : index
    %c0_11 = arith.constant 0 : index
    %c0_12 = arith.constant 0 : index
    %13 = vector.load %arg0[%c1, %c0_11, %c0_12] : memref<7x8x256xbf16, #tpu.memory_space<vmem>>, vector<1x8x256xbf16>
    %14 = vector.shape_cast %13 : vector<1x8x256xbf16> to vector<8x256xbf16>
    %c1_13 = arith.constant 1 : index
    %c0_14 = arith.constant 0 : index
    %c0_15 = arith.constant 0 : index
    %15 = vector.load %arg1[%c1_13, %c0_14, %c0_15] : memref<7x256x256xbf16, #tpu.memory_space<vmem>>, vector<1x256x256xbf16>
    %16 = vector.shape_cast %15 : vector<1x256x256xbf16> to vector<256x256xbf16>
    %cst_16 = arith.constant dense<0.000000e+00> : vector<8x256xf32>
    %17 = tpu.matmul %14, %16, %cst_16 {dimension_numbers = #tpu.dot_dimension_numbers<[1], [0], [0], [1], [0, 0, 1, 1], [], []>} : vector<8x256xbf16>, vector<256x256xbf16>, vector<8x256xf32> -> vector<8x256xf32>
    %c1_17 = arith.constant 1 : index
    %c0_18 = arith.constant 0 : index
    %c0_19 = arith.constant 0 : index
    %18 = vector.load %arg2[%c1_17, %c0_18, %c0_19] : memref<7x1x256xf32, #tpu.memory_space<vmem>>, vector<1x1x256xf32>
    %19 = vector.shape_cast %18 : vector<1x1x256xf32> to vector<1x256xf32>
    %20 = vector.broadcast %19 : vector<1x256xf32> to vector<8x256xf32>
    %21 = arith.addf %17, %20 : vector<8x256xf32>
    %cst_20 = arith.constant 0.000000e+00 : f32
    %22 = vector.broadcast %cst_20 : f32 to vector<8x256xf32>
    %23 = arith.maximumf %21, %22 : vector<8x256xf32>
    %24 = vector.extract_strided_slice %23 {offsets = [0, 0], sizes = [2, 256], strides = [1, 1]} : vector<8x256xf32> to vector<2x256xf32>
    %25 = vector.extract_strided_slice %23 {offsets = [2, 0], sizes = [2, 256], strides = [1, 1]} : vector<8x256xf32> to vector<2x256xf32>
    %26 = arith.addf %24, %25 : vector<2x256xf32>
    %27 = vector.extract_strided_slice %23 {offsets = [4, 0], sizes = [2, 256], strides = [1, 1]} : vector<8x256xf32> to vector<2x256xf32>
    %28 = arith.addf %26, %27 : vector<2x256xf32>
    %c0_21 = arith.constant 0 : index
    %c256 = arith.constant 256 : index
    %29 = vector.load %arg6[%c0_21, %c256] : memref<2x1792xf32, #tpu.memory_space<vmem>>, vector<2x256xf32>
    tpu.vector_store %arg6[%c0_21, %c256], %28 {strides = array<i32>} : memref<2x1792xf32, #tpu.memory_space<vmem>>, vector<2x256xf32>,
    %c2 = arith.constant 2 : index
    %c0_22 = arith.constant 0 : index
    %c0_23 = arith.constant 0 : index
    %30 = vector.load %arg0[%c2, %c0_22, %c0_23] : memref<7x8x256xbf16, #tpu.memory_space<vmem>>, vector<1x8x256xbf16>
    %31 = vector.shape_cast %30 : vector<1x8x256xbf16> to vector<8x256xbf16>
    %c2_24 = arith.constant 2 : index
    %c0_25 = arith.constant 0 : index
    %c0_26 = arith.constant 0 : index
    %32 = vector.load %arg1[%c2_24, %c0_25, %c0_26] : memref<7x256x256xbf16, #tpu.memory_space<vmem>>, vector<1x256x256xbf16>
    %33 = vector.shape_cast %32 : vector<1x256x256xbf16> to vector<256x256xbf16>
    %cst_27 = arith.constant dense<0.000000e+00> : vector<8x256xf32>
    %34 = tpu.matmul %31, %33, %cst_27 {dimension_numbers = #tpu.dot_dimension_numbers<[1], [0], [0], [1], [0, 0, 1, 1], [], []>} : vector<8x256xbf16>, vector<256x256xbf16>, vector<8x256xf32> -> vector<8x256xf32>
    %c2_28 = arith.constant 2 : index
    %c0_29 = arith.constant 0 : index
    %c0_30 = arith.constant 0 : index
    %35 = vector.load %arg2[%c2_28, %c0_29, %c0_30] : memref<7x1x256xf32, #tpu.memory_space<vmem>>, vector<1x1x256xf32>
    %36 = vector.shape_cast %35 : vector<1x1x256xf32> to vector<1x256xf32>
    %37 = vector.broadcast %36 : vector<1x256xf32> to vector<8x256xf32>
    %38 = arith.addf %34, %37 : vector<8x256xf32>
    %cst_31 = arith.constant 0.000000e+00 : f32
    %39 = vector.broadcast %cst_31 : f32 to vector<8x256xf32>
    %40 = arith.maximumf %38, %39 : vector<8x256xf32>
    %41 = vector.extract_strided_slice %40 {offsets = [0, 0], sizes = [2, 256], strides = [1, 1]} : vector<8x256xf32> to vector<2x256xf32>
    %42 = vector.extract_strided_slice %40 {offsets = [2, 0], sizes = [2, 256], strides = [1, 1]} : vector<8x256xf32> to vector<2x256xf32>
    %43 = arith.addf %41, %42 : vector<2x256xf32>
    %44 = vector.extract_strided_slice %40 {offsets = [4, 0], sizes = [2, 256], strides = [1, 1]} : vector<8x256xf32> to vector<2x256xf32>
    %45 = arith.addf %43, %44 : vector<2x256xf32>
    %c0_32 = arith.constant 0 : index
    %c512 = arith.constant 512 : index
    %46 = vector.load %arg6[%c0_32, %c512] : memref<2x1792xf32, #tpu.memory_space<vmem>>, vector<2x256xf32>
    tpu.vector_store %arg6[%c0_32, %c512], %45 {strides = array<i32>} : memref<2x1792xf32, #tpu.memory_space<vmem>>, vector<2x256xf32>,
    %c3 = arith.constant 3 : index
    %c0_33 = arith.constant 0 : index
    %c0_34 = arith.constant 0 : index
    %47 = vector.load %arg0[%c3, %c0_33, %c0_34] : memref<7x8x256xbf16, #tpu.memory_space<vmem>>, vector<1x8x256xbf16>
    %48 = vector.shape_cast %47 : vector<1x8x256xbf16> to vector<8x256xbf16>
    %c3_35 = arith.constant 3 : index
    %c0_36 = arith.constant 0 : index
    %c0_37 = arith.constant 0 : index
    %49 = vector.load %arg1[%c3_35, %c0_36, %c0_37] : memref<7x256x256xbf16, #tpu.memory_space<vmem>>, vector<1x256x256xbf16>
    %50 = vector.shape_cast %49 : vector<1x256x256xbf16> to vector<256x256xbf16>
    %cst_38 = arith.constant dense<0.000000e+00> : vector<8x256xf32>
    %51 = tpu.matmul %48, %50, %cst_38 {dimension_numbers = #tpu.dot_dimension_numbers<[1], [0], [0], [1], [0, 0, 1, 1], [], []>} : vector<8x256xbf16>, vector<256x256xbf16>, vector<8x256xf32> -> vector<8x256xf32>
    %c3_39 = arith.constant 3 : index
    %c0_40 = arith.constant 0 : index
    %c0_41 = arith.constant 0 : index
    %52 = vector.load %arg2[%c3_39, %c0_40, %c0_41] : memref<7x1x256xf32, #tpu.memory_space<vmem>>, vector<1x1x256xf32>
    %53 = vector.shape_cast %52 : vector<1x1x256xf32> to vector<1x256xf32>
    %54 = vector.broadcast %53 : vector<1x256xf32> to vector<8x256xf32>
    %55 = arith.addf %51, %54 : vector<8x256xf32>
    %cst_42 = arith.constant 0.000000e+00 : f32
    %56 = vector.broadcast %cst_42 : f32 to vector<8x256xf32>
    %57 = arith.maximumf %55, %56 : vector<8x256xf32>
    %58 = vector.extract_strided_slice %57 {offsets = [0, 0], sizes = [2, 256], strides = [1, 1]} : vector<8x256xf32> to vector<2x256xf32>
    %59 = vector.extract_strided_slice %57 {offsets = [2, 0], sizes = [2, 256], strides = [1, 1]} : vector<8x256xf32> to vector<2x256xf32>
    %60 = arith.addf %58, %59 : vector<2x256xf32>
    %61 = vector.extract_strided_slice %57 {offsets = [4, 0], sizes = [2, 256], strides = [1, 1]} : vector<8x256xf32> to vector<2x256xf32>
    %62 = arith.addf %60, %61 : vector<2x256xf32>
    %c0_43 = arith.constant 0 : index
    %c768 = arith.constant 768 : index
    %63 = vector.load %arg6[%c0_43, %c768] : memref<2x1792xf32, #tpu.memory_space<vmem>>, vector<2x256xf32>
    tpu.vector_store %arg6[%c0_43, %c768], %62 {strides = array<i32>} : memref<2x1792xf32, #tpu.memory_space<vmem>>, vector<2x256xf32>,
    %c4 = arith.constant 4 : index
    %c0_44 = arith.constant 0 : index
    %c0_45 = arith.constant 0 : index
    %64 = vector.load %arg0[%c4, %c0_44, %c0_45] : memref<7x8x256xbf16, #tpu.memory_space<vmem>>, vector<1x8x256xbf16>
    %65 = vector.shape_cast %64 : vector<1x8x256xbf16> to vector<8x256xbf16>
    %c4_46 = arith.constant 4 : index
    %c0_47 = arith.constant 0 : index
    %c0_48 = arith.constant 0 : index
    %66 = vector.load %arg1[%c4_46, %c0_47, %c0_48] : memref<7x256x256xbf16, #tpu.memory_space<vmem>>, vector<1x256x256xbf16>
    %67 = vector.shape_cast %66 : vector<1x256x256xbf16> to vector<256x256xbf16>
    %cst_49 = arith.constant dense<0.000000e+00> : vector<8x256xf32>
    %68 = tpu.matmul %65, %67, %cst_49 {dimension_numbers = #tpu.dot_dimension_numbers<[1], [0], [0], [1], [0, 0, 1, 1], [], []>} : vector<8x256xbf16>, vector<256x256xbf16>, vector<8x256xf32> -> vector<8x256xf32>
    %c4_50 = arith.constant 4 : index
    %c0_51 = arith.constant 0 : index
    %c0_52 = arith.constant 0 : index
    %69 = vector.load %arg2[%c4_50, %c0_51, %c0_52] : memref<7x1x256xf32, #tpu.memory_space<vmem>>, vector<1x1x256xf32>
    %70 = vector.shape_cast %69 : vector<1x1x256xf32> to vector<1x256xf32>
    %71 = vector.broadcast %70 : vector<1x256xf32> to vector<8x256xf32>
    %72 = arith.addf %68, %71 : vector<8x256xf32>
    %cst_53 = arith.constant 0.000000e+00 : f32
    %73 = vector.broadcast %cst_53 : f32 to vector<8x256xf32>
    %74 = arith.maximumf %72, %73 : vector<8x256xf32>
    %75 = vector.extract_strided_slice %74 {offsets = [0, 0], sizes = [2, 256], strides = [1, 1]} : vector<8x256xf32> to vector<2x256xf32>
    %76 = vector.extract_strided_slice %74 {offsets = [2, 0], sizes = [2, 256], strides = [1, 1]} : vector<8x256xf32> to vector<2x256xf32>
    %77 = arith.addf %75, %76 : vector<2x256xf32>
    %78 = vector.extract_strided_slice %74 {offsets = [4, 0], sizes = [2, 256], strides = [1, 1]} : vector<8x256xf32> to vector<2x256xf32>
    %79 = arith.addf %77, %78 : vector<2x256xf32>
    %c0_54 = arith.constant 0 : index
    %c1024 = arith.constant 1024 : index
    %80 = vector.load %arg6[%c0_54, %c1024] : memref<2x1792xf32, #tpu.memory_space<vmem>>, vector<2x256xf32>
    tpu.vector_store %arg6[%c0_54, %c1024], %79 {strides = array<i32>} : memref<2x1792xf32, #tpu.memory_space<vmem>>, vector<2x256xf32>,
    %c5 = arith.constant 5 : index
    %c0_55 = arith.constant 0 : index
    %c0_56 = arith.constant 0 : index
    %81 = vector.load %arg0[%c5, %c0_55, %c0_56] : memref<7x8x256xbf16, #tpu.memory_space<vmem>>, vector<1x8x256xbf16>
    %82 = vector.shape_cast %81 : vector<1x8x256xbf16> to vector<8x256xbf16>
    %c5_57 = arith.constant 5 : index
    %c0_58 = arith.constant 0 : index
    %c0_59 = arith.constant 0 : index
    %83 = vector.load %arg1[%c5_57, %c0_58, %c0_59] : memref<7x256x256xbf16, #tpu.memory_space<vmem>>, vector<1x256x256xbf16>
    %84 = vector.shape_cast %83 : vector<1x256x256xbf16> to vector<256x256xbf16>
    %cst_60 = arith.constant dense<0.000000e+00> : vector<8x256xf32>
    %85 = tpu.matmul %82, %84, %cst_60 {dimension_numbers = #tpu.dot_dimension_numbers<[1], [0], [0], [1], [0, 0, 1, 1], [], []>} : vector<8x256xbf16>, vector<256x256xbf16>, vector<8x256xf32> -> vector<8x256xf32>
    %c5_61 = arith.constant 5 : index
    %c0_62 = arith.constant 0 : index
    %c0_63 = arith.constant 0 : index
    %86 = vector.load %arg2[%c5_61, %c0_62, %c0_63] : memref<7x1x256xf32, #tpu.memory_space<vmem>>, vector<1x1x256xf32>
    %87 = vector.shape_cast %86 : vector<1x1x256xf32> to vector<1x256xf32>
    %88 = vector.broadcast %87 : vector<1x256xf32> to vector<8x256xf32>
    %89 = arith.addf %85, %88 : vector<8x256xf32>
    %cst_64 = arith.constant 0.000000e+00 : f32
    %90 = vector.broadcast %cst_64 : f32 to vector<8x256xf32>
    %91 = arith.maximumf %89, %90 : vector<8x256xf32>
    %92 = vector.extract_strided_slice %91 {offsets = [0, 0], sizes = [2, 256], strides = [1, 1]} : vector<8x256xf32> to vector<2x256xf32>
    %93 = vector.extract_strided_slice %91 {offsets = [2, 0], sizes = [2, 256], strides = [1, 1]} : vector<8x256xf32> to vector<2x256xf32>
    %94 = arith.addf %92, %93 : vector<2x256xf32>
    %95 = vector.extract_strided_slice %91 {offsets = [4, 0], sizes = [2, 256], strides = [1, 1]} : vector<8x256xf32> to vector<2x256xf32>
    %96 = arith.addf %94, %95 : vector<2x256xf32>
    %c0_65 = arith.constant 0 : index
    %c1280 = arith.constant 1280 : index
    %97 = vector.load %arg6[%c0_65, %c1280] : memref<2x1792xf32, #tpu.memory_space<vmem>>, vector<2x256xf32>
    tpu.vector_store %arg6[%c0_65, %c1280], %96 {strides = array<i32>} : memref<2x1792xf32, #tpu.memory_space<vmem>>, vector<2x256xf32>,
    %c6 = arith.constant 6 : index
    %c0_66 = arith.constant 0 : index
    %c0_67 = arith.constant 0 : index
    %98 = vector.load %arg0[%c6, %c0_66, %c0_67] : memref<7x8x256xbf16, #tpu.memory_space<vmem>>, vector<1x8x256xbf16>
    %99 = vector.shape_cast %98 : vector<1x8x256xbf16> to vector<8x256xbf16>
    %c6_68 = arith.constant 6 : index
    %c0_69 = arith.constant 0 : index
    %c0_70 = arith.constant 0 : index
    %100 = vector.load %arg1[%c6_68, %c0_69, %c0_70] : memref<7x256x256xbf16, #tpu.memory_space<vmem>>, vector<1x256x256xbf16>
    %101 = vector.shape_cast %100 : vector<1x256x256xbf16> to vector<256x256xbf16>
    %cst_71 = arith.constant dense<0.000000e+00> : vector<8x256xf32>
    %102 = tpu.matmul %99, %101, %cst_71 {dimension_numbers = #tpu.dot_dimension_numbers<[1], [0], [0], [1], [0, 0, 1, 1], [], []>} : vector<8x256xbf16>, vector<256x256xbf16>, vector<8x256xf32> -> vector<8x256xf32>
    %c6_72 = arith.constant 6 : index
    %c0_73 = arith.constant 0 : index
    %c0_74 = arith.constant 0 : index
    %103 = vector.load %arg2[%c6_72, %c0_73, %c0_74] : memref<7x1x256xf32, #tpu.memory_space<vmem>>, vector<1x1x256xf32>
    %104 = vector.shape_cast %103 : vector<1x1x256xf32> to vector<1x256xf32>
    %105 = vector.broadcast %104 : vector<1x256xf32> to vector<8x256xf32>
    %106 = arith.addf %102, %105 : vector<8x256xf32>
    %cst_75 = arith.constant 0.000000e+00 : f32
    %107 = vector.broadcast %cst_75 : f32 to vector<8x256xf32>
    %108 = arith.maximumf %106, %107 : vector<8x256xf32>
    %109 = vector.extract_strided_slice %108 {offsets = [0, 0], sizes = [2, 256], strides = [1, 1]} : vector<8x256xf32> to vector<2x256xf32>
    %110 = vector.extract_strided_slice %108 {offsets = [2, 0], sizes = [2, 256], strides = [1, 1]} : vector<8x256xf32> to vector<2x256xf32>
    %111 = arith.addf %109, %110 : vector<2x256xf32>
    %112 = vector.extract_strided_slice %108 {offsets = [4, 0], sizes = [2, 256], strides = [1, 1]} : vector<8x256xf32> to vector<2x256xf32>
    %113 = arith.addf %111, %112 : vector<2x256xf32>
    %c0_76 = arith.constant 0 : index
    %c1536 = arith.constant 1536 : index
    %114 = vector.load %arg6[%c0_76, %c1536] : memref<2x1792xf32, #tpu.memory_space<vmem>>, vector<2x256xf32>
    tpu.vector_store %arg6[%c0_76, %c1536], %113 {strides = array<i32>} : memref<2x1792xf32, #tpu.memory_space<vmem>>, vector<2x256xf32>,
    %c0_77 = arith.constant 0 : index
    %c0_78 = arith.constant 0 : index
    %115 = vector.load %arg6[%c0_77, %c0_78] : memref<2x1792xf32, #tpu.memory_space<vmem>>, vector<2x1792xf32>
    %c0_79 = arith.constant 0 : index
    %c0_80 = arith.constant 0 : index
    %116 = vector.load %arg3[%c0_79, %c0_80] : memref<1792x4xf32, #tpu.memory_space<vmem>>, vector<1792x4xf32>
    %cst_81 = arith.constant dense<0.000000e+00> : vector<2x4xf32>
    %117 = tpu.matmul %115, %116, %cst_81 {dimension_numbers = #tpu.dot_dimension_numbers<[1], [0], [0], [1], [0, 0, 1, 1], [], []>} : vector<2x1792xf32>, vector<1792x4xf32>, vector<2x4xf32> -> vector<2x4xf32>
    %c0_82 = arith.constant 0 : index
    %c0_83 = arith.constant 0 : index
    %118 = vector.load %arg4[%c0_82, %c0_83] : memref<1x4xf32, #tpu.memory_space<vmem>>, vector<1x4xf32>
    %119 = vector.broadcast %118 : vector<1x4xf32> to vector<2x4xf32>
    %120 = arith.addf %117, %119 : vector<2x4xf32>
    %c0_84 = arith.constant 0 : index
    %c0_85 = arith.constant 0 : index
    %121 = vector.load %arg5[%c0_84, %c0_85] : memref<2x4xf32, #tpu.memory_space<vmem>>, vector<2x4xf32>
    tpu.vector_store %arg5[%c0_84, %c0_85], %120 {strides = array<i32>} : memref<2x4xf32, #tpu.memory_space<vmem>>, vector<2x4xf32>,
    return
  }
}

</mosaic_0001>

<bundles_post_ra>
// kernel: _trn_forward.1
= control target key start
LH: loop header
LB: loop body
LE: loop exit
PB: predicated region body
PF: predicated region fallthrough
CT: control target
= control target key end

     0   :  { %s5373_s0 = inlined_call_operand.vmem [shape: bf16[7,8,256], index: 0, kind: input, shape index: {}]   ;;  %s5374_s1 = inlined_call_operand.vmem [shape: bf16[7,256,256], index: 1, kind: input, shape index: {}]   ;;  %s5375_s2 = inlined_call_operand.vmem [shape: f32[7,1,256], index: 2, kind: input, shape index: {}]   ;;  %s5376_s3 = inlined_call_operand.vmem [shape: f32[1792,4], index: 3, kind: input, shape index: {}]   ;;  %s5377_s4 = inlined_call_operand.vmem [shape: f32[1,4], index: 4, kind: input, shape index: {}]   ;;  %s5378_s5 = inlined_call_operand.hbm [shape: f32[2,4], index: 5, kind: output, shape index: {}]  }
   0x1   :  { %v3508_v0 = vld [vmem:[%s5374_s1 + $0x74] ss:$8 sps:$4 sm:$0xff]   ;;  %v3512_v2 = vld [vmem:[%s5374_s1 + $0x70] ss:$8 sps:$4 sm:$0xff]   ;;  %v3514_v4 = vld [vmem:[%s5374_s1 + $0x64] ss:$8 sps:$4 sm:$0xff]  }
   0x2   :  { %v3510_v1 = vld [vmem:[%s5374_s1 + $0x174] ss:$8 sps:$4 sm:$0xff]   ;;  %233 = vmatprep.subr.bf16.mxu0 %v3508_v0  ;;  %v3513_v3 = vld [vmem:[%s5374_s1 + $0x170] ss:$8 sps:$4 sm:$0xff]   ;;  %v3516_v5 = vld [vmem:[%s5374_s1 + $0x164] ss:$8 sps:$4 sm:$0xff]  }
   0x3   :  { %503 = vmatprep.subr.bf16.mxu1 %v3510_v1  ;;  %234 = vmatpush1.bf16.msra.mxu0 %v3512_v2  ;;  %v3518_v6 = vld [vmem:[%s5374_s1 + $0x60] ss:$8 sps:$4 sm:$0xff]   ;;  %v3520_v8 = vld [vmem:[%s5374_s1 + $0x54] ss:$8 sps:$4 sm:$0xff]   ;;  %v3524_v10 = vld [vmem:[%s5374_s1 + $0x50] ss:$8 sps:$4 sm:$0xff]  }
   0x4   :  { %504 = vmatpush1.bf16.msra.mxu1 %v3513_v3  ;;  %235 = vmatprep.subr.bf16.mxu0 %v3514_v4  ;;  %v3519_v7 = vld [vmem:[%s5374_s1 + $0x160] ss:$8 sps:$4 sm:$0xff]   ;;  %v3522_v9 = vld [vmem:[%s5374_s1 + $0x154] ss:$8 sps:$4 sm:$0xff]   ;;  %v3525_v11 = vld [vmem:[%s5374_s1 + $0x150] ss:$8 sps:$4 sm:$0xff]  }
   0x5   :  { %505 = vmatprep.subr.bf16.mxu1 %v3516_v5  ;;  %v3526_v12 = vld [vmem:[%s5374_s1 + $0x44] ss:$8 sps:$4 sm:$0xff]   ;;  %v3530_v14 = vld [vmem:[%s5374_s1 + $0x40] ss:$8 sps:$4 sm:$0xff]   ;;  %v3532_v16 = vld [vmem:[%s5374_s1 + $0x34] ss:$8 sps:$4 sm:$0xff]  }
   0x6   :  { %v3528_v13 = vld [vmem:[%s5374_s1 + $0x144] ss:$8 sps:$4 sm:$0xff]   ;;  %v3531_v15 = vld [vmem:[%s5374_s1 + $0x140] ss:$8 sps:$4 sm:$0xff]   ;;  %v3534_v17 = vld [vmem:[%s5374_s1 + $0x134] ss:$8 sps:$4 sm:$0xff]  }
   0x7   :  { %236 = vmatpush1.bf16.msra.mxu0 %v3518_v6  ;;  %v3536_v18 = vld [vmem:[%s5374_s1 + $0x30] ss:$8 sps:$4 sm:$0xff]   ;;  %v3538_v20 = vld [vmem:[%s5374_s1 + $0x24] ss:$8 sps:$4 sm:$0xff]   ;;  %v3542_v22 = vld [vmem:[%s5374_s1 + $0x20] ss:$8 sps:$4 sm:$0xff]  }
   0x8   :  { %506 = vmatpush1.bf16.msra.mxu1 %v3519_v7  ;;  %237 = vmatprep.subr.bf16.mxu0 %v3520_v8  ;;  %v3537_v19 = vld [vmem:[%s5374_s1 + $0x130] ss:$8 sps:$4 sm:$0xff]   ;;  %v3540_v21 = vld [vmem:[%s5374_s1 + $0x124] ss:$8 sps:$4 sm:$0xff]   ;;  %v3543_v23 = vld [vmem:[%s5374_s1 + $0x120] ss:$8 sps:$4 sm:$0xff]  }
   0x9   :  { %507 = vmatprep.subr.bf16.mxu1 %v3522_v9  ;;  %v3544_v24 = vld [vmem:[%s5374_s1 + $0x14] ss:$8 sps:$4 sm:$0xff]   ;;  %v3548_v26 = vld [vmem:[%s5374_s1 + $0x10] ss:$8 sps:$4 sm:$0xff]   ;;  %v3550_v28 = vld [vmem:[%s5374_s1 + $0x4] ss:$8 sps:$4 sm:$0xff]  }
   0xa   :  { %v3546_v25 = vld [vmem:[%s5374_s1 + $0x114] ss:$8 sps:$4 sm:$0xff]   ;;  %v3549_v27 = vld [vmem:[%s5374_s1 + $0x110] ss:$8 sps:$4 sm:$0xff]   ;;  %v3552_v29 = vld [vmem:[%s5374_s1 + $0x104] ss:$8 sps:$4 sm:$0xff]  }
   0xb   :  { %238 = vmatpush1.bf16.msra.mxu0 %v3524_v10  ;;  %v3554_v30 = vld [vmem:[%s5374_s1] ss:$8 sps:$4 sm:$0xff]   ;;  %v3556_v32 = vld [vmem:[%s5374_s1 + $0xf4] ss:$8 sps:$4 sm:$0xff]   ;;  %v3560_v34 = vld [vmem:[%s5374_s1 + $0xf0] ss:$8 sps:$4 sm:$0xff]  }
   0xc   :  { %508 = vmatpush1.bf16.msra.mxu1 %v3525_v11  ;;  %239 = vmatprep.subr.bf16.mxu0 %v3526_v12  ;;  %v3555_v31 = vld [vmem:[%s5374_s1 + $0x100] ss:$8 sps:$4 sm:$0xff]   ;;  %v3558_v33 = vld [vmem:[%s5374_s1 + $0x1f4] ss:$8 sps:$4 sm:$0xff]   ;;  %v3561_v35 = vld [vmem:[%s5374_s1 + $0x1f0] ss:$8 sps:$4 sm:$0xff]  }
   0xd   :  { %509 = vmatprep.subr.bf16.mxu1 %v3528_v13  ;;  %v3562_v36 = vld [vmem:[%s5374_s1 + $0xe4] ss:$8 sps:$4 sm:$0xff]   ;;  %v3566_v38 = vld [vmem:[%s5374_s1 + $0xe0] ss:$8 sps:$4 sm:$0xff]   ;;  %v3568_v40 = vld [vmem:[%s5374_s1 + $0xd4] ss:$8 sps:$4 sm:$0xff]  }
   0xe   :  { %v3564_v37 = vld [vmem:[%s5374_s1 + $0x1e4] ss:$8 sps:$4 sm:$0xff]   ;;  %v3567_v39 = vld [vmem:[%s5374_s1 + $0x1e0] ss:$8 sps:$4 sm:$0xff]   ;;  %v3570_v41 = vld [vmem:[%s5374_s1 + $0x1d4] ss:$8 sps:$4 sm:$0xff]  }
   0xf   :  { %240 = vmatpush1.bf16.msra.mxu0 %v3530_v14  ;;  %v3572_v42 = vld [vmem:[%s5374_s1 + $0xd0] ss:$8 sps:$4 sm:$0xff]   ;;  %v3574_v44 = vld [vmem:[%s5374_s1 + $0xc4] ss:$8 sps:$4 sm:$0xff]   ;;  %v3578_v49 = vld [vmem:[%s5374_s1 + $0xc0] ss:$8 sps:$4 sm:$0xff]  }
  0x10   :  { %510 = vmatpush1.bf16.msra.mxu1 %v3531_v15  ;;  %241 = vmatprep.subr.bf16.mxu0 %v3532_v16  ;;  %v3573_v43 = vld [vmem:[%s5374_s1 + $0x1d0] ss:$8 sps:$4 sm:$0xff]   ;;  %v3576_v45 = vld [vmem:[%s5374_s1 + $0x1c4] ss:$8 sps:$4 sm:$0xff]   ;;  %v3579_v50 = vld [vmem:[%s5374_s1 + $0x1c0] ss:$8 sps:$4 sm:$0xff]  }
  0x11   :  { %511 = vmatprep.subr.bf16.mxu1 %v3534_v17  ;;  %v21_v46 = vld [vmem:[%s5373_s0] sm:$0xff]  ;;  %v2845_v48 = vld [vmem:[%s5373_s0 + $0x8] sm:$0xff]  ;;  %v3580_v52 = vld [vmem:[%s5374_s1 + $0xb4] ss:$8 sps:$4 sm:$0xff]  }
  0x12   :  { %v2811_v47 = vcombine.high %v21_v46, %v21_v46  ;;  %v2880_v51 = vcombine.high %v2845_v48, %v2845_v48  ;;  %v3582_v53 = vld [vmem:[%s5374_s1 + $0x1b4] ss:$8 sps:$4 sm:$0xff]   ;;  %v3584_v54 = vld [vmem:[%s5374_s1 + $0xb0] ss:$8 sps:$4 sm:$0xff]   ;;  %v3586_v56 = vld [vmem:[%s5374_s1 + $0xa4] ss:$8 sps:$4 sm:$0xff]   ;;  %v2810_v6 = vcombine.low %v21_v46, %v21_v46  ;;  %v2879_v7 = vcombine.low %v2845_v48, %v2845_v48 }
  0x13   :  { %242 = vmatpush1.bf16.msra.mxu0 %v3536_v18  ;;  %v3585_v55 = vld [vmem:[%s5374_s1 + $0x1b0] ss:$8 sps:$4 sm:$0xff]   ;;  %v3588_v57 = vld [vmem:[%s5374_s1 + $0x1a4] ss:$8 sps:$4 sm:$0xff]   ;;  %v3590_v58 = vld [vmem:[%s5374_s1 + $0xa0] ss:$8 sps:$4 sm:$0xff]  }
  0x14   :  { %512 = vmatpush1.bf16.msra.mxu1 %v3537_v19  ;;  %243 = vmatprep.subr.bf16.mxu0 %v3538_v20  ;;  %v3591_v59 = vld [vmem:[%s5374_s1 + $0x1a0] ss:$8 sps:$4 sm:$0xff]   ;;  %v3592_v60 = vld [vmem:[%s5374_s1 + $0x94] ss:$8 sps:$4 sm:$0xff]   ;;  %v3596_v62 = vld [vmem:[%s5374_s1 + $0x90] ss:$8 sps:$4 sm:$0xff]  }
  0x15   :  { %513 = vmatprep.subr.bf16.mxu1 %v3540_v21  ;;  %265 = vmatprep.mubr.bf16.mxu0 %v2811_v47  ;;  %v3594_v61 = vld [vmem:[%s5374_s1 + $0x194] ss:$8 sps:$4 sm:$0xff]   ;;  %v3597_v63 = vld [vmem:[%s5374_s1 + $0x190] ss:$8 sps:$4 sm:$0xff]   ;;  %v3598_v0 = vld [vmem:[%s5374_s1 + $0x84] ss:$8 sps:$4 sm:$0xff]  }
  0x16   :  { %535 = vmatprep.mubr.bf16.mxu1 %v2880_v51  ;;  %v3600_v1 = vld [vmem:[%s5374_s1 + $0x184] ss:$8 sps:$4 sm:$0xff]   ;;  %v3602_v2 = vld [vmem:[%s5374_s1 + $0x80] ss:$8 sps:$4 sm:$0xff]   ;;  %v3610_v4 = vld [vmem:[%s5374_s1 + $0x274] ss:$8 sps:$4 sm:$0xff]  }
  0x17   :  { %244 = vmatpush1.bf16.msra.mxu0 %v3542_v22  ;;  %v3603_v3 = vld [vmem:[%s5374_s1 + $0x180] ss:$8 sps:$4 sm:$0xff]   ;;  %v3613_v5 = vld [vmem:[%s5374_s1 + $0x374] ss:$8 sps:$4 sm:$0xff]   ;;  %v3608_v8 = vld [vmem:[%s5374_s1 + $0x270] ss:$8 sps:$4 sm:$0xff]  }
  0x18   :  { %514 = vmatpush1.bf16.msra.mxu1 %v3543_v23  ;;  %245 = vmatprep.subr.bf16.mxu0 %v3544_v24  ;;  %v3611_v9 = vld [vmem:[%s5374_s1 + $0x370] ss:$8 sps:$4 sm:$0xff]   ;;  %v3616_v10 = vld [vmem:[%s5374_s1 + $0x264] ss:$8 sps:$4 sm:$0xff]   ;;  %v3614_v12 = vld [vmem:[%s5374_s1 + $0x260] ss:$8 sps:$4 sm:$0xff]  }
  0x19   :  { %515 = vmatprep.subr.bf16.mxu1 %v3546_v25  ;;  %v3619_v11 = vld [vmem:[%s5374_s1 + $0x364] ss:$8 sps:$4 sm:$0xff]   ;;  %v3617_v13 = vld [vmem:[%s5374_s1 + $0x360] ss:$8 sps:$4 sm:$0xff]   ;;  %v3622_v14 = vld [vmem:[%s5374_s1 + $0x254] ss:$8 sps:$4 sm:$0xff]  }
  0x1a   :  { %v3625_v15 = vld [vmem:[%s5374_s1 + $0x354] ss:$8 sps:$4 sm:$0xff]   ;;  %v3620_v16 = vld [vmem:[%s5374_s1 + $0x250] ss:$8 sps:$4 sm:$0xff]   ;;  %v3628_v18 = vld [vmem:[%s5374_s1 + $0x244] ss:$8 sps:$4 sm:$0xff]  }
  0x1b   :  { %246 = vmatpush1.bf16.msra.mxu0 %v3548_v26  ;;  %v3623_v17 = vld [vmem:[%s5374_s1 + $0x350] ss:$8 sps:$4 sm:$0xff]   ;;  %v3631_v19 = vld [vmem:[%s5374_s1 + $0x344] ss:$8 sps:$4 sm:$0xff]   ;;  %v3626_v20 = vld [vmem:[%s5374_s1 + $0x240] ss:$8 sps:$4 sm:$0xff]  }
  0x1c   :  { %516 = vmatpush1.bf16.msra.mxu1 %v3549_v27  ;;  %247 = vmatprep.subr.bf16.mxu0 %v3550_v28  ;;  %v3629_v21 = vld [vmem:[%s5374_s1 + $0x340] ss:$8 sps:$4 sm:$0xff]   ;;  %v3634_v22 = vld [vmem:[%s5374_s1 + $0x234] ss:$8 sps:$4 sm:$0xff]   ;;  %v3632_v24 = vld [vmem:[%s5374_s1 + $0x230] ss:$8 sps:$4 sm:$0xff]  }
  0x1d   :  { %517 = vmatprep.subr.bf16.mxu1 %v3552_v29  ;;  %v3637_v23 = vld [vmem:[%s5374_s1 + $0x334] ss:$8 sps:$4 sm:$0xff]   ;;  %v3635_v25 = vld [vmem:[%s5374_s1 + $0x330] ss:$8 sps:$4 sm:$0xff]   ;;  %v3640_v26 = vld [vmem:[%s5374_s1 + $0x224] ss:$8 sps:$4 sm:$0xff]  }
  0x1e   :  { %v3643_v27 = vld [vmem:[%s5374_s1 + $0x324] ss:$8 sps:$4 sm:$0xff]   ;;  %v3638_v28 = vld [vmem:[%s5374_s1 + $0x220] ss:$8 sps:$4 sm:$0xff]   ;;  %v3673_v51 = vld [vmem:[%s5374_s1 + $0x3d4] ss:$8 sps:$4 sm:$0xff]  }
  0x1f   :  { %248 = vmatpush1.bf16.msra.mxu0 %v3554_v30  ;;  %v3641_v29 = vld [vmem:[%s5374_s1 + $0x320] ss:$8 sps:$4 sm:$0xff]   ;;  %v3646_v30 = vld [vmem:[%s5374_s1 + $0x214] ss:$8 sps:$4 sm:$0xff]   ;;  %v3664_v46 = vld [vmem:[%s5374_s1 + $0x2e4] ss:$8 sps:$4 sm:$0xff]  }
  0x20   :  { %518 = vmatpush1.bf16.msra.mxu1 %v3555_v31  ;;  %249 = vmatprep.subr.bf16.mxu0 %v3556_v32  ;;  %v3649_v31 = vld [vmem:[%s5374_s1 + $0x314] ss:$8 sps:$4 sm:$0xff]   ;;  %v3667_v47 = vld [vmem:[%s5374_s1 + $0x3e4] ss:$8 sps:$4 sm:$0xff]   ;;  %v3662_v48 = vld [vmem:[%s5374_s1 + $0x2e0] ss:$8 sps:$4 sm:$0xff]  }
  0x21   :  { %519 = vmatprep.subr.bf16.mxu1 %v3558_v33  ;;  %v4194_v32 = vld [vmem:[%s5373_s0 + $0x10] sm:$0xff]  ;;  %v4199_v33 = vld [vmem:[%s5373_s0 + $0x18] sm:$0xff] }
  0x23   :  { %250 = vmatpush2.bf16.msra.mxu0 %v3560_v34  ;;  %v3644_v34 = vld [vmem:[%s5374_s1 + $0x210] ss:$8 sps:$4 sm:$0xff]  }
  0x24   :  { %520 = vmatpush2.bf16.msra.mxu1 %v3561_v35  ;;  %251 = vmatprep.subr.bf16.mxu0 %v3562_v36  ;;  %v3647_v35 = vld [vmem:[%s5374_s1 + $0x310] ss:$8 sps:$4 sm:$0xff]   ;;  %v2949_v36 = vcombine.high %v4194_v32, %v4194_v32 }
  0x25   :  { %521 = vmatprep.subr.bf16.mxu1 %v3564_v37  ;;  %v3018_v37 = vcombine.high %v4199_v33, %v4199_v33 }
  0x27   :  { %252 = vmatpush2.bf16.msra.mxu0 %v3566_v38  ;;  %v3652_v38 = vld [vmem:[%s5374_s1 + $0x204] ss:$8 sps:$4 sm:$0xff]  }
  0x28   :  { %522 = vmatpush2.bf16.msra.mxu1 %v3567_v39  ;;  %253 = vmatprep.subr.bf16.mxu0 %v3568_v40  ;;  %v3655_v39 = vld [vmem:[%s5374_s1 + $0x304] ss:$8 sps:$4 sm:$0xff]   ;;  %v3650_v40 = vld [vmem:[%s5374_s1 + $0x200] ss:$8 sps:$4 sm:$0xff]  }
  0x29   :  { %523 = vmatprep.subr.bf16.mxu1 %v3570_v41  ;;  %v3653_v41 = vld [vmem:[%s5374_s1 + $0x300] ss:$8 sps:$4 sm:$0xff]  }
  0x2b   :  { %254 = vmatpush2.bf16.msra.mxu0 %v3572_v42  ;;  %v3658_v42 = vld [vmem:[%s5374_s1 + $0x2f4] ss:$8 sps:$4 sm:$0xff]  }
  0x2c   :  { %524 = vmatpush2.bf16.msra.mxu1 %v3573_v43  ;;  %255 = vmatprep.subr.bf16.mxu0 %v3574_v44  ;;  %v3661_v43 = vld [vmem:[%s5374_s1 + $0x3f4] ss:$8 sps:$4 sm:$0xff]   ;;  %v3656_v44 = vld [vmem:[%s5374_s1 + $0x2f0] ss:$8 sps:$4 sm:$0xff]  }
  0x2d   :  { %525 = vmatprep.subr.bf16.mxu1 %v3576_v45  ;;  %v3659_v45 = vld [vmem:[%s5374_s1 + $0x3f0] ss:$8 sps:$4 sm:$0xff]  }
  0x2f   :  { %256 = vmatpush2.bf16.msra.mxu0 %v3578_v49  ;;  %v3665_v49 = vld [vmem:[%s5374_s1 + $0x3e0] ss:$8 sps:$4 sm:$0xff]  }
  0x30   :  { %526 = vmatpush2.bf16.msra.mxu1 %v3579_v50  ;;  %257 = vmatprep.subr.bf16.mxu0 %v3580_v52  ;;  %v3670_v50 = vld [vmem:[%s5374_s1 + $0x2d4] ss:$8 sps:$4 sm:$0xff]   ;;  %v3668_v52 = vld [vmem:[%s5374_s1 + $0x2d0] ss:$8 sps:$4 sm:$0xff]  }
  0x31   :  { %527 = vmatprep.subr.bf16.mxu1 %v3582_v53  ;;  %v3671_v53 = vld [vmem:[%s5374_s1 + $0x3d0] ss:$8 sps:$4 sm:$0xff]  }
  0x33   :  { %258 = vmatpush2.bf16.msra.mxu0 %v3584_v54  ;;  %v3676_v54 = vld [vmem:[%s5374_s1 + $0x2c4] ss:$8 sps:$4 sm:$0xff]  }
  0x34   :  { %528 = vmatpush2.bf16.msra.mxu1 %v3585_v55  ;;  %259 = vmatprep.subr.bf16.mxu0 %v3586_v56  ;;  %v3679_v55 = vld [vmem:[%s5374_s1 + $0x3c4] ss:$8 sps:$4 sm:$0xff]   ;;  %v3674_v56 = vld [vmem:[%s5374_s1 + $0x2c0] ss:$8 sps:$4 sm:$0xff]  }
  0x35   :  { %529 = vmatprep.subr.bf16.mxu1 %v3588_v57  ;;  %v3677_v57 = vld [vmem:[%s5374_s1 + $0x3c0] ss:$8 sps:$4 sm:$0xff]  }
  0x37   :  { %260 = vmatpush2.bf16.msra.mxu0 %v3590_v58  ;;  %v3682_v58 = vld [vmem:[%s5374_s1 + $0x2b4] ss:$8 sps:$4 sm:$0xff]  }
  0x38   :  { %530 = vmatpush2.bf16.msra.mxu1 %v3591_v59  ;;  %261 = vmatprep.subr.bf16.mxu0 %v3592_v60  ;;  %v3685_v59 = vld [vmem:[%s5374_s1 + $0x3b4] ss:$8 sps:$4 sm:$0xff]   ;;  %v3680_v60 = vld [vmem:[%s5374_s1 + $0x2b0] ss:$8 sps:$4 sm:$0xff]  }
  0x39   :  { %531 = vmatprep.subr.bf16.mxu1 %v3594_v61  ;;  %v3683_v61 = vld [vmem:[%s5374_s1 + $0x3b0] ss:$8 sps:$4 sm:$0xff]  }
  0x3b   :  { %262 = vmatpush2.bf16.msra.mxu0 %v3596_v62  ;;  %v3688_v62 = vld [vmem:[%s5374_s1 + $0x2a4] ss:$8 sps:$4 sm:$0xff]  }
  0x3c   :  { %532 = vmatpush2.bf16.msra.mxu1 %v3597_v63  ;;  %263 = vmatprep.subr.bf16.mxu0 %v3598_v0  ;;  %v3691_v63 = vld [vmem:[%s5374_s1 + $0x3a4] ss:$8 sps:$4 sm:$0xff]   ;;  %v3686_v0 = vld [vmem:[%s5374_s1 + $0x2a0] ss:$8 sps:$4 sm:$0xff]  }
  0x3d   :  { %533 = vmatprep.subr.bf16.mxu1 %v3600_v1  ;;  %v3689_v1 = vld [vmem:[%s5374_s1 + $0x3a0] ss:$8 sps:$4 sm:$0xff]  }
  0x3f   :  { %264 = vmatpush2.bf16.msra.mxu0 %v3602_v2  ;;  %v3694_v2 = vld [vmem:[%s5374_s1 + $0x294] ss:$8 sps:$4 sm:$0xff]  }
  0x40   :  { %534 = vmatpush2.bf16.msra.mxu1 %v3603_v3  ;;  %787 = vmatprep.subr.bf16.mxu0 %v3610_v4  ;;  %v3697_v3 = vld [vmem:[%s5374_s1 + $0x394] ss:$8 sps:$4 sm:$0xff]   ;;  %v3692_v4 = vld [vmem:[%s5374_s1 + $0x290] ss:$8 sps:$4 sm:$0xff]  }
  0x41   :  { %1071 = vmatprep.subr.bf16.mxu1 %v3613_v5  ;;  %v3695_v5 = vld [vmem:[%s5374_s1 + $0x390] ss:$8 sps:$4 sm:$0xff]  }
  0x42   :  { %266 = vmatmul.mubr.bf16.vlgmr.msra.gmra.mxu0 %v2810_v6  ;;  %v3700_v6 = vld [vmem:[%s5374_s1 + $0x284] ss:$8 sps:$4 sm:$0xff]  }
  0x43   :  { %536 = vmatmul.mubr.bf16.vlgmr.msra.gmra.mxu1 %v2879_v7  ;;  %788 = vmatpush1.bf16.msra.mxu0 %v3608_v8  ;;  %v3703_v7 = vld [vmem:[%s5374_s1 + $0x384] ss:$8 sps:$4 sm:$0xff]   ;;  %v3698_v8 = vld [vmem:[%s5374_s1 + $0x280] ss:$8 sps:$4 sm:$0xff]  }
  0x44   :  { %1072 = vmatpush1.bf16.msra.mxu1 %v3611_v9  ;;  %789 = vmatprep.subr.bf16.mxu0 %v3616_v10  ;;  %v3701_v9 = vld [vmem:[%s5374_s1 + $0x380] ss:$8 sps:$4 sm:$0xff]   ;;  %v3710_v10 = vld [vmem:[%s5374_s1 + $0x474] ss:$8 sps:$4 sm:$0xff]  }
  0x45   :  { %1073 = vmatprep.subr.bf16.mxu1 %v3619_v11  ;;  %819 = vmatprep.mubr.bf16.mxu0 %v2949_v36  ;;  %v3713_v11 = vld [vmem:[%s5374_s1 + $0x574] ss:$8 sps:$4 sm:$0xff]   ;;  %v3740_v36 = vld [vmem:[%s5374_s1 + $0x424] ss:$8 sps:$4 sm:$0xff]  }
  0x46   :  { %1103 = vmatprep.mubr.bf16.mxu1 %v3018_v37  ;;  %v3743_v37 = vld [vmem:[%s5374_s1 + $0x524] ss:$8 sps:$4 sm:$0xff]  }
  0x47   :  { %790 = vmatpush1.bf16.msra.mxu0 %v3614_v12  ;;  %v2948_v12 = vcombine.low %v4194_v32, %v4194_v32  ;;  %v3734_v32 = vld [vmem:[%s5374_s1 + $0x434] ss:$8 sps:$4 sm:$0xff]  }
  0x48   :  { %1074 = vmatpush1.bf16.msra.mxu1 %v3617_v13  ;;  %791 = vmatprep.subr.bf16.mxu0 %v3622_v14  ;;  %v3017_v13 = vcombine.low %v4199_v33, %v4199_v33  ;;  %v3708_v14 = vld [vmem:[%s5374_s1 + $0x470] ss:$8 sps:$4 sm:$0xff]   ;;  %v3737_v33 = vld [vmem:[%s5374_s1 + $0x534] ss:$8 sps:$4 sm:$0xff]  }
  0x49   :  { %1075 = vmatprep.subr.bf16.mxu1 %v3625_v15  ;;  %v3711_v15 = vld [vmem:[%s5374_s1 + $0x570] ss:$8 sps:$4 sm:$0xff]  }
  0x4b   :  { %792 = vmatpush1.bf16.msra.mxu0 %v3620_v16  ;;  %v3716_v16 = vld [vmem:[%s5374_s1 + $0x464] ss:$8 sps:$4 sm:$0xff]  }
  0x4c   :  { %1076 = vmatpush1.bf16.msra.mxu1 %v3623_v17  ;;  %793 = vmatprep.subr.bf16.mxu0 %v3628_v18  ;;  %v3719_v17 = vld [vmem:[%s5374_s1 + $0x564] ss:$8 sps:$4 sm:$0xff]  }
  0x4d   :  { %1077 = vmatprep.subr.bf16.mxu1 %v3631_v19  ;;  %v4344_v18 = vld [vmem:[%s5373_s0 + $0x20] sm:$0xff]  ;;  %v4349_v19 = vld [vmem:[%s5373_s0 + $0x28] sm:$0xff] }
  0x4f   :  { %794 = vmatpush1.bf16.msra.mxu0 %v3626_v20  ;;  %v3087_v20 = vcombine.high %v4344_v18, %v4344_v18 }
  0x50   :  { %1078 = vmatpush1.bf16.msra.mxu1 %v3629_v21  ;;  %795 = vmatprep.subr.bf16.mxu0 %v3634_v22  ;;  %v3156_v21 = vcombine.high %v4349_v19, %v4349_v19  ;;  %v3714_v22 = vld [vmem:[%s5374_s1 + $0x460] ss:$8 sps:$4 sm:$0xff]  }
  0x51   :  { %1079 = vmatprep.subr.bf16.mxu1 %v3637_v23  ;;  %v3717_v23 = vld [vmem:[%s5374_s1 + $0x560] ss:$8 sps:$4 sm:$0xff]  }
  0x53   :  { %796 = vmatpush1.bf16.msra.mxu0 %v3632_v24  ;;  %v3722_v24 = vld [vmem:[%s5374_s1 + $0x454] ss:$8 sps:$4 sm:$0xff]  }
  0x54   :  { %1080 = vmatpush1.bf16.msra.mxu1 %v3635_v25  ;;  %797 = vmatprep.subr.bf16.mxu0 %v3640_v26  ;;  %v3725_v25 = vld [vmem:[%s5374_s1 + $0x554] ss:$8 sps:$4 sm:$0xff]   ;;  %v3720_v26 = vld [vmem:[%s5374_s1 + $0x450] ss:$8 sps:$4 sm:$0xff]  }
  0x55   :  { %1081 = vmatprep.subr.bf16.mxu1 %v3643_v27  ;;  %v3723_v27 = vld [vmem:[%s5374_s1 + $0x550] ss:$8 sps:$4 sm:$0xff]  }
  0x57   :  { %798 = vmatpush1.bf16.msra.mxu0 %v3638_v28  ;;  %v3728_v28 = vld [vmem:[%s5374_s1 + $0x444] ss:$8 sps:$4 sm:$0xff]  }
  0x58   :  { %1082 = vmatpush1.bf16.msra.mxu1 %v3641_v29  ;;  %799 = vmatprep.subr.bf16.mxu0 %v3646_v30  ;;  %v3731_v29 = vld [vmem:[%s5374_s1 + $0x544] ss:$8 sps:$4 sm:$0xff]   ;;  %v3726_v30 = vld [vmem:[%s5374_s1 + $0x440] ss:$8 sps:$4 sm:$0xff]  }
  0x59   :  { %1083 = vmatprep.subr.bf16.mxu1 %v3649_v31  ;;  %v3729_v31 = vld [vmem:[%s5374_s1 + $0x540] ss:$8 sps:$4 sm:$0xff]  }
  0x5b   :  { %800 = vmatpush1.bf16.msra.mxu0 %v3644_v34  ;;  %v3732_v34 = vld [vmem:[%s5374_s1 + $0x430] ss:$8 sps:$4 sm:$0xff]  }
  0x5c   :  { %1084 = vmatpush1.bf16.msra.mxu1 %v3647_v35  ;;  %801 = vmatprep.subr.bf16.mxu0 %v3652_v38  ;;  %v3735_v35 = vld [vmem:[%s5374_s1 + $0x530] ss:$8 sps:$4 sm:$0xff]   ;;  %v3738_v38 = vld [vmem:[%s5374_s1 + $0x420] ss:$8 sps:$4 sm:$0xff]  }
  0x5d   :  { %1085 = vmatprep.subr.bf16.mxu1 %v3655_v39  ;;  %v3741_v39 = vld [vmem:[%s5374_s1 + $0x520] ss:$8 sps:$4 sm:$0xff]  }
  0x5f   :  { %802 = vmatpush1.bf16.msra.mxu0 %v3650_v40  ;;  %v3746_v40 = vld [vmem:[%s5374_s1 + $0x414] ss:$8 sps:$4 sm:$0xff]  }
  0x60   :  { %1086 = vmatpush1.bf16.msra.mxu1 %v3653_v41  ;;  %803 = vmatprep.subr.bf16.mxu0 %v3658_v42  ;;  %v3749_v41 = vld [vmem:[%s5374_s1 + $0x514] ss:$8 sps:$4 sm:$0xff]   ;;  %v3744_v42 = vld [vmem:[%s5374_s1 + $0x410] ss:$8 sps:$4 sm:$0xff]  }
  0x61   :  { %1087 = vmatprep.subr.bf16.mxu1 %v3661_v43  ;;  %v3747_v43 = vld [vmem:[%s5374_s1 + $0x510] ss:$8 sps:$4 sm:$0xff]  }
  0x63   :  { %804 = vmatpush2.bf16.msra.mxu0 %v3656_v44  ;;  %v3752_v44 = vld [vmem:[%s5374_s1 + $0x404] ss:$8 sps:$4 sm:$0xff]  }
  0x64   :  { %1088 = vmatpush2.bf16.msra.mxu1 %v3659_v45  ;;  %805 = vmatprep.subr.bf16.mxu0 %v3664_v46  ;;  %v3755_v45 = vld [vmem:[%s5374_s1 + $0x504] ss:$8 sps:$4 sm:$0xff]   ;;  %v3750_v46 = vld [vmem:[%s5374_s1 + $0x400] ss:$8 sps:$4 sm:$0xff]  }
  0x65   :  { %1089 = vmatprep.subr.bf16.mxu1 %v3667_v47  ;;  %v3753_v47 = vld [vmem:[%s5374_s1 + $0x500] ss:$8 sps:$4 sm:$0xff]  }
  0x67   :  { %806 = vmatpush2.bf16.msra.mxu0 %v3662_v48  ;;  %v3758_v48 = vld [vmem:[%s5374_s1 + $0x4f4] ss:$8 sps:$4 sm:$0xff]  }
  0x68   :  { %1090 = vmatpush2.bf16.msra.mxu1 %v3665_v49  ;;  %807 = vmatprep.subr.bf16.mxu0 %v3670_v50  ;;  %v3761_v49 = vld [vmem:[%s5374_s1 + $0x5f4] ss:$8 sps:$4 sm:$0xff]   ;;  %v3756_v50 = vld [vmem:[%s5374_s1 + $0x4f0] ss:$8 sps:$4 sm:$0xff]  }
  0x69   :  { %1091 = vmatprep.subr.bf16.mxu1 %v3673_v51  ;;  %v3759_v51 = vld [vmem:[%s5374_s1 + $0x5f0] ss:$8 sps:$4 sm:$0xff]  }
  0x6b   :  { %808 = vmatpush2.bf16.msra.mxu0 %v3668_v52  ;;  %v3764_v52 = vld [vmem:[%s5374_s1 + $0x4e4] ss:$8 sps:$4 sm:$0xff]  }
  0x6c   :  { %1092 = vmatpush2.bf16.msra.mxu1 %v3671_v53  ;;  %809 = vmatprep.subr.bf16.mxu0 %v3676_v54  ;;  %v3767_v53 = vld [vmem:[%s5374_s1 + $0x5e4] ss:$8 sps:$4 sm:$0xff]   ;;  %v3762_v54 = vld [vmem:[%s5374_s1 + $0x4e0] ss:$8 sps:$4 sm:$0xff]  }
  0x6d   :  { %1093 = vmatprep.subr.bf16.mxu1 %v3679_v55  ;;  %v3765_v55 = vld [vmem:[%s5374_s1 + $0x5e0] ss:$8 sps:$4 sm:$0xff]  }
  0x6f   :  { %810 = vmatpush2.bf16.msra.mxu0 %v3674_v56  ;;  %v3770_v56 = vld [vmem:[%s5374_s1 + $0x4d4] ss:$8 sps:$4 sm:$0xff]  }
  0x70   :  { %1094 = vmatpush2.bf16.msra.mxu1 %v3677_v57  ;;  %811 = vmatprep.subr.bf16.mxu0 %v3682_v58  ;;  %v3773_v57 = vld [vmem:[%s5374_s1 + $0x5d4] ss:$8 sps:$4 sm:$0xff]  }
  0x71   :  { %1095 = vmatprep.subr.bf16.mxu1 %v3685_v59 }
  0x73   :  { %812 = vmatpush2.bf16.msra.mxu0 %v3680_v60 }
  0x74   :  { %1096 = vmatpush2.bf16.msra.mxu1 %v3683_v61  ;;  %813 = vmatprep.subr.bf16.mxu0 %v3688_v62 }
  0x75   :  { %1097 = vmatprep.subr.bf16.mxu1 %v3691_v63 }
  0x77   :  { %814 = vmatpush2.bf16.msra.mxu0 %v3686_v0 }
  0x78   :  { %1098 = vmatpush2.bf16.msra.mxu1 %v3689_v1  ;;  %815 = vmatprep.subr.bf16.mxu0 %v3694_v2 }
  0x79   :  { %1099 = vmatprep.subr.bf16.mxu1 %v3697_v3 }
  0x7b   :  { %816 = vmatpush2.bf16.msra.mxu0 %v3692_v4 }
  0x7c   :  { %1100 = vmatpush2.bf16.msra.mxu1 %v3695_v5  ;;  %817 = vmatprep.subr.bf16.mxu0 %v3700_v6 }
  0x7d   :  { %1101 = vmatprep.subr.bf16.mxu1 %v3703_v7 }
  0x7f   :  { %818 = vmatpush2.bf16.msra.mxu0 %v3698_v8 }
  0x80   :  { %1102 = vmatpush2.bf16.msra.mxu1 %v3701_v9  ;;  %1355 = vmatprep.subr.bf16.mxu0 %v3710_v10 }
  0x81   :  { %1639 = vmatprep.subr.bf16.mxu1 %v3713_v11 }
  0x82   :  { %820 = vmatmul.mubr.bf16.vlgmr.msra.gmra.mxu0 %v2948_v12 }
  0x83   :  { %1104 = vmatmul.mubr.bf16.vlgmr.msra.gmra.mxu1 %v3017_v13  ;;  %1356 = vmatpush1.bf16.msra.mxu0 %v3708_v14 }
  0x84   :  { %1640 = vmatpush1.bf16.msra.mxu1 %v3711_v15  ;;  %1357 = vmatprep.subr.bf16.mxu0 %v3716_v16 }
  0x85   :  { %1641 = vmatprep.subr.bf16.mxu1 %v3719_v17  ;;  %1387 = vmatprep.mubr.bf16.mxu0 %v3087_v20 }
  0x86   :  { %1671 = vmatprep.mubr.bf16.mxu1 %v3156_v21 }
  0x87   :  { %1358 = vmatpush1.bf16.msra.mxu0 %v3714_v22 }
  0x88   :  { %1642 = vmatpush1.bf16.msra.mxu1 %v3717_v23  ;;  %1359 = vmatprep.subr.bf16.mxu0 %v3722_v24 }
  0x89   :  { %1643 = vmatprep.subr.bf16.mxu1 %v3725_v25 }
  0x8b   :  { %1360 = vmatpush1.bf16.msra.mxu0 %v3720_v26 }
  0x8c   :  { %1644 = vmatpush1.bf16.msra.mxu1 %v3723_v27  ;;  %1361 = vmatprep.subr.bf16.mxu0 %v3728_v28 }
  0x8d   :  { %1645 = vmatprep.subr.bf16.mxu1 %v3731_v29 }
  0x8f   :  { %1362 = vmatpush1.bf16.msra.mxu0 %v3726_v30 }
  0x90   :  { %1646 = vmatpush1.bf16.msra.mxu1 %v3729_v31  ;;  %1363 = vmatprep.subr.bf16.mxu0 %v3734_v32 }
  0x91   :  { %1647 = vmatprep.subr.bf16.mxu1 %v3737_v33 }
  0x93   :  { %1364 = vmatpush1.bf16.msra.mxu0 %v3732_v34 }
  0x94   :  { %1648 = vmatpush1.bf16.msra.mxu1 %v3735_v35  ;;  %1365 = vmatprep.subr.bf16.mxu0 %v3740_v36 }
  0x95   :  { %1649 = vmatprep.subr.bf16.mxu1 %v3743_v37 }
  0x97   :  { %1366 = vmatpush1.bf16.msra.mxu0 %v3738_v38 }
  0x98   :  { %1650 = vmatpush1.bf16.msra.mxu1 %v3741_v39  ;;  %1367 = vmatprep.subr.bf16.mxu0 %v3746_v40 }
  0x99   :  { %1651 = vmatprep.subr.bf16.mxu1 %v3749_v41 }
  0x9b   :  { %1368 = vmatpush1.bf16.msra.mxu0 %v3744_v42 }
  0x9c   :  { %1652 = vmatpush1.bf16.msra.mxu1 %v3747_v43  ;;  %1369 = vmatprep.subr.bf16.mxu0 %v3752_v44 }
  0x9d   :  { %1653 = vmatprep.subr.bf16.mxu1 %v3755_v45 }
  0x9f   :  { %1370 = vmatpush1.bf16.msra.mxu0 %v3750_v46 }
  0xa0   :  { %1654 = vmatpush1.bf16.msra.mxu1 %v3753_v47  ;;  %1371 = vmatprep.subr.bf16.mxu0 %v3758_v48 }
  0xa1   :  { %1655 = vmatprep.subr.bf16.mxu1 %v3761_v49 }
  0xa3   :  { %1372 = vmatpush2.bf16.msra.mxu0 %v3756_v50 }
  0xa4   :  { %1656 = vmatpush2.bf16.msra.mxu1 %v3759_v51  ;;  %1373 = vmatprep.subr.bf16.mxu0 %v3764_v52 }
  0xa5   :  { %1657 = vmatprep.subr.bf16.mxu1 %v3767_v53 }
  0xa6   :  { %10 = vsyncpa [#allocation4], 0  ;;  %v3768_v58 = vld [vmem:[%s5374_s1 + $0x4d0] ss:$8 sps:$4 sm:$0xff]   ;;  %v3776_v60 = vld [vmem:[%s5374_s1 + $0x4c4] ss:$8 sps:$4 sm:$0xff]   ;;  %v3086_v20 = vcombine.low %v4344_v18, %v4344_v18  ;;  %v3155_v21 = vcombine.low %v4349_v19, %v4349_v19 }
  0xa7   :  { %1374 = vmatpush2.bf16.msra.mxu0 %v3762_v54  ;;  %v3771_v59 = vld [vmem:[%s5374_s1 + $0x5d0] ss:$8 sps:$4 sm:$0xff]   ;;  %v3779_v61 = vld [vmem:[%s5374_s1 + $0x5c4] ss:$8 sps:$4 sm:$0xff]   ;;  %v3774_v62 = vld [vmem:[%s5374_s1 + $0x4c0] ss:$8 sps:$4 sm:$0xff]  }
  0xa8   :  { %1658 = vmatpush2.bf16.msra.mxu1 %v3765_v55  ;;  %1375 = vmatprep.subr.bf16.mxu0 %v3770_v56  ;;  %v3777_v63 = vld [vmem:[%s5374_s1 + $0x5c0] ss:$8 sps:$4 sm:$0xff]   ;;  %v3782_v0 = vld [vmem:[%s5374_s1 + $0x4b4] ss:$8 sps:$4 sm:$0xff]   ;;  %v3780_v2 = vld [vmem:[%s5374_s1 + $0x4b0] ss:$8 sps:$4 sm:$0xff]  }
  0xa9   :  { %1659 = vmatprep.subr.bf16.mxu1 %v3773_v57  ;;  %v3785_v1 = vld [vmem:[%s5374_s1 + $0x5b4] ss:$8 sps:$4 sm:$0xff]   ;;  %v3783_v3 = vld [vmem:[%s5374_s1 + $0x5b0] ss:$8 sps:$4 sm:$0xff]   ;;  %v3788_v4 = vld [vmem:[%s5374_s1 + $0x4a4] ss:$8 sps:$4 sm:$0xff]  }
  0xaa   :  { %v3791_v5 = vld [vmem:[%s5374_s1 + $0x5a4] ss:$8 sps:$4 sm:$0xff]   ;;  %v3786_v6 = vld [vmem:[%s5374_s1 + $0x4a0] ss:$8 sps:$4 sm:$0xff]   ;;  %v3794_v8 = vld [vmem:[%s5374_s1 + $0x494] ss:$8 sps:$4 sm:$0xff]  }
  0xab   :  { %1376 = vmatpush2.bf16.msra.mxu0 %v3768_v58  ;;  %v3789_v7 = vld [vmem:[%s5374_s1 + $0x5a0] ss:$8 sps:$4 sm:$0xff]   ;;  %v3797_v9 = vld [vmem:[%s5374_s1 + $0x594] ss:$8 sps:$4 sm:$0xff]   ;;  %v3792_v10 = vld [vmem:[%s5374_s1 + $0x490] ss:$8 sps:$4 sm:$0xff]  }
  0xac   :  { %1660 = vmatpush2.bf16.msra.mxu1 %v3771_v59  ;;  %1377 = vmatprep.subr.bf16.mxu0 %v3776_v60  ;;  %v3795_v11 = vld [vmem:[%s5374_s1 + $0x590] ss:$8 sps:$4 sm:$0xff]   ;;  %v3800_v12 = vld [vmem:[%s5374_s1 + $0x484] ss:$8 sps:$4 sm:$0xff]   ;;  %v3798_v14 = vld [vmem:[%s5374_s1 + $0x480] ss:$8 sps:$4 sm:$0xff]  }
  0xad   :  { %1661 = vmatprep.subr.bf16.mxu1 %v3779_v61  ;;  %v3803_v13 = vld [vmem:[%s5374_s1 + $0x584] ss:$8 sps:$4 sm:$0xff]   ;;  %v3801_v15 = vld [vmem:[%s5374_s1 + $0x580] ss:$8 sps:$4 sm:$0xff]   ;;  %v3810_v16 = vld [vmem:[%s5374_s1 + $0x674] ss:$8 sps:$4 sm:$0xff]  }
  0xae   :  { %v2027_v17 = vld [vmem:[%s5376_s3 + $0xf8] sm:$0xff]  ;;  %v4542_v22 = vld [vmem:[%s5373_s0 + $0x30] sm:$0xff]  ;;  %v3813_v24 = vld [vmem:[%s5374_s1 + $0x664] ss:$8 sps:$4 sm:$0xff]   ;;  %vm2794_vm0 = vcmask 25600  }
  0xaf   :  { %1378 = vmatpush2.bf16.msra.mxu0 %v3774_v62  ;;  %v3808_v23 = vld [vmem:[%s5374_s1 + $0x670] ss:$8 sps:$4 sm:$0xff]   ;;  %v3225_v25 = vcombine.high %v4542_v22, %v4542_v22  ;;  %v3811_v27 = vld [vmem:[%s5374_s1 + $0x660] ss:$8 sps:$4 sm:$0xff]   ;;  %v3816_v29 = vld [vmem:[%s5374_s1 + $0x654] ss:$8 sps:$4 sm:$0xff]  }
  0xb0   :  { %1662 = vmatpush2.bf16.msra.mxu1 %v3777_v63  ;;  %1379 = vmatprep.subr.bf16.mxu0 %v3782_v0  ;;  %v2011_v18 = vld [vmem:[%s5376_s3 + $0x78] sm:$0xff]  ;;  %v2026_v19 = vld [vmem:[%s5376_s3 + $0xf0] sm:$0xff]  ;;  %v2025_v28 = vld [vmem:[%s5376_s3 + $0xe8] sm:$0xff] }
  0xb1   :  { %1663 = vmatprep.subr.bf16.mxu1 %v3785_v1  ;;  %v2010_v26 = vld [vmem:[%s5376_s3 + $0x70] sm:$0xff]  ;;  %v2009_v30 = vld [vmem:[%s5376_s3 + $0x68] sm:$0xff]  ;;  %v2024_v31 = vld [vmem:[%s5376_s3 + $0xe0] sm:$0xff] }
  0xb2   :  { %v2008_v32 = vld [vmem:[%s5376_s3 + $0x60] sm:$0xff]  ;;  %v3814_v33 = vld [vmem:[%s5374_s1 + $0x650] ss:$8 sps:$4 sm:$0xff]   ;;  %v2021_v40 = vld [vmem:[%s5376_s3 + $0xc8] sm:$0xff] }
  0xb3   :  { %1380 = vmatpush2.bf16.msra.mxu0 %v3780_v2  ;;  %v2023_v34 = vld [vmem:[%s5376_s3 + $0xd8] sm:$0xff]  ;;  %v3819_v35 = vld [vmem:[%s5374_s1 + $0x644] ss:$8 sps:$4 sm:$0xff]   ;;  %v2022_v37 = vld [vmem:[%s5376_s3 + $0xd0] sm:$0xff] }
  0xb4   :  { %1664 = vmatpush2.bf16.msra.mxu1 %v3783_v3  ;;  %1381 = vmatprep.subr.bf16.mxu0 %v3788_v4  ;;  %v2007_v36 = vld [vmem:[%s5376_s3 + $0x58] sm:$0xff]  ;;  %v2006_v38 = vld [vmem:[%s5376_s3 + $0x50] sm:$0xff]  ;;  %v3817_v39 = vld [vmem:[%s5374_s1 + $0x640] ss:$8 sps:$4 sm:$0xff]  }
  0xb5   :  { %1665 = vmatprep.subr.bf16.mxu1 %v3791_v5  ;;  %v3822_v41 = vld [vmem:[%s5374_s1 + $0x634] ss:$8 sps:$4 sm:$0xff]   ;;  %v2005_v42 = vld [vmem:[%s5376_s3 + $0x48] sm:$0xff]  ;;  %v2020_v43 = vld [vmem:[%s5376_s3 + $0xc0] sm:$0xff] }
  0xb6   :  { %v2004_v44 = vld [vmem:[%s5376_s3 + $0x40] sm:$0xff]  ;;  %v3820_v45 = vld [vmem:[%s5374_s1 + $0x630] ss:$8 sps:$4 sm:$0xff]   ;;  %v2017_v52 = vld [vmem:[%s5376_s3 + $0xa8] sm:$0xff] }
  0xb7   :  { %1382 = vmatpush2.bf16.msra.mxu0 %v3786_v6  ;;  %v2019_v46 = vld [vmem:[%s5376_s3 + $0xb8] sm:$0xff]  ;;  %v3825_v47 = vld [vmem:[%s5374_s1 + $0x624] ss:$8 sps:$4 sm:$0xff]   ;;  %v2018_v49 = vld [vmem:[%s5376_s3 + $0xb0] sm:$0xff] }
  0xb8   :  { %1666 = vmatpush2.bf16.msra.mxu1 %v3789_v7  ;;  %1383 = vmatprep.subr.bf16.mxu0 %v3794_v8  ;;  %v2003_v48 = vld [vmem:[%s5376_s3 + $0x38] sm:$0xff]  ;;  %v2002_v50 = vld [vmem:[%s5376_s3 + $0x30] sm:$0xff]  ;;  %v3823_v51 = vld [vmem:[%s5374_s1 + $0x620] ss:$8 sps:$4 sm:$0xff]  }
  0xb9   :  { %1667 = vmatprep.subr.bf16.mxu1 %v3797_v9  ;;  %v3828_v53 = vld [vmem:[%s5374_s1 + $0x614] ss:$8 sps:$4 sm:$0xff]   ;;  %v2001_v54 = vld [vmem:[%s5376_s3 + $0x28] sm:$0xff]  ;;  %v2016_v55 = vld [vmem:[%s5376_s3 + $0xa0] sm:$0xff] }
  0xba   :  { %v2000_v56 = vld [vmem:[%s5376_s3 + $0x20] sm:$0xff]  ;;  %v3826_v57 = vld [vmem:[%s5374_s1 + $0x610] ss:$8 sps:$4 sm:$0xff]   ;;  %v2013_v0 = vld [vmem:[%s5376_s3 + $0x88] sm:$0xff] }
  0xbb   :  { %1384 = vmatpush2.bf16.msra.mxu0 %v3792_v10  ;;  %v2015_v58 = vld [vmem:[%s5376_s3 + $0x98] sm:$0xff]  ;;  %v3831_v59 = vld [vmem:[%s5374_s1 + $0x604] ss:$8 sps:$4 sm:$0xff]   ;;  %v2014_v61 = vld [vmem:[%s5376_s3 + $0x90] sm:$0xff] }
  0xbc   :  { %1668 = vmatpush2.bf16.msra.mxu1 %v3795_v11  ;;  %1385 = vmatprep.subr.bf16.mxu0 %v3800_v12  ;;  %v1999_v60 = vld [vmem:[%s5376_s3 + $0x18] sm:$0xff]  ;;  %v1998_v62 = vld [vmem:[%s5376_s3 + $0x10] sm:$0xff]  ;;  %v3829_v63 = vld [vmem:[%s5374_s1 + $0x600] ss:$8 sps:$4 sm:$0xff]  }
  0xbd   :  { %1669 = vmatprep.subr.bf16.mxu1 %v3803_v13  ;;  %v3834_v1 = vld [vmem:[%s5374_s1 + $0x6f4] ss:$8 sps:$4 sm:$0xff]   ;;  %v1997_v2 = vld [vmem:[%s5376_s3 + $0x8] sm:$0xff]  ;;  %v2012_v3 = vld [vmem:[%s5376_s3 + $0x80] sm:$0xff] }
  0xbe   :  { %v1996_v4 = vld [vmem:[%s5376_s3] sm:$0xff]  ;;  %v3832_v5 = vld [vmem:[%s5374_s1 + $0x6f0] ss:$8 sps:$4 sm:$0xff]   ;;  %v3840_v9 = vld [vmem:[%s5374_s1 + $0x6d4] ss:$8 sps:$4 sm:$0xff]  }
  0xbf   :  { %1386 = vmatpush2.bf16.msra.mxu0 %v3798_v14  ;;  %v2059_v6 = vld [vmem:[%s5376_s3 + $0x1f8] sm:$0xff]  ;;  %v3837_v7 = vld [vmem:[%s5374_s1 + $0x6e4] ss:$8 sps:$4 sm:$0xff]   ;;  %v3835_v8 = vld [vmem:[%s5374_s1 + $0x6e0] ss:$8 sps:$4 sm:$0xff]  }
  0xc0   :  { %1670 = vmatpush2.bf16.msra.mxu1 %v3801_v15  ;;  %1923 = vmatprep.subr.bf16.mxu0 %v3810_v16  ;;  %v3838_v10 = vld [vmem:[%s5374_s1 + $0x6d0] ss:$8 sps:$4 sm:$0xff]   ;;  %v3843_v11 = vld [vmem:[%s5374_s1 + $0x6c4] ss:$8 sps:$4 sm:$0xff]   ;;  %v3841_v12 = vld [vmem:[%s5374_s1 + $0x6c0] ss:$8 sps:$4 sm:$0xff]  }
  0xc1   :  { %3261 = vmatprep.subr.mxu1 %v2027_v17  ;;  %v3846_v13 = vld [vmem:[%s5374_s1 + $0x6b4] ss:$8 sps:$4 sm:$0xff]   ;;  %v3844_v14 = vld [vmem:[%s5374_s1 + $0x6b0] ss:$8 sps:$4 sm:$0xff]   ;;  %v3849_v15 = vld [vmem:[%s5374_s1 + $0x6a4] ss:$8 sps:$4 sm:$0xff]   ;;  %v56_v17 = vlaneseq }
  0xc2   :  { %1388 = vmatmul.mubr.bf16.vlgmr.msra.gmra.mxu0 %v3086_v20  ;;  %v3847_v16 = vld [vmem:[%s5374_s1 + $0x6a0] ss:$8 sps:$4 sm:$0xff]   ;;  %v3852_v20 = vld [vmem:[%s5374_s1 + $0x694] ss:$8 sps:$4 sm:$0xff]  }
  0xc3   :  { %1672 = vmatmul.mubr.bf16.vlgmr.msra.gmra.mxu1 %v3155_v21  ;;  %1924 = vmatpush1.bf16.msra.mxu0 %v3808_v23  ;;  %v3850_v21 = vld [vmem:[%s5374_s1 + $0x690] ss:$8 sps:$4 sm:$0xff]   ;;  %v4729_v23 = vshrl.u32 %v56_v17, 7  ;;  %v2081_v17 = vld [vmem:[%s5376_s3 + $0x2a8] sm:$0xff] }
  0xc4   :  { %3262 = vmatpush3.msra.mxu1 %v2011_v18  ;;  %1925 = vmatprep.subr.bf16.mxu0 %v3813_v24  ;;  %v3855_v24 = vld [vmem:[%s5374_s1 + $0x684] ss:$8 sps:$4 sm:$0xff]   ;;  %v3853_v18 = vld [vmem:[%s5374_s1 + $0x680] ss:$8 sps:$4 sm:$0xff]  }
  0xc5   :  { %3263 = vmatprep.subr.mxu1 %v2026_v19  ;;  %1955 = vmatprep.mubr.bf16.mxu0 %v3225_v25  ;;  %v4738_v19 = vsub.s32 0, %v4729_v23  ;;  %v54_v25 = vld [vmem:[%s5375_s2] sm:$0x3] }
  0xc6   :  { %3264 = vmatpush3.msra.mxu1 %v2010_v26  ;;  %v2878_v26 = vld [vmem:[%s5375_s2 + $0x2] sm:$0x3] }
  0xc7   :  { %3265 = vmatprep.subr.mxu1 %v2025_v28  ;;  %1926 = vmatpush1.bf16.msra.mxu0 %v3811_v27  ;;  %v4747_v27 = vsub.s32 1, %v4729_v23  ;;  %v2091_v28 = vld [vmem:[%s5376_s3 + $0x2f8] sm:$0xff] }
  0xc8   :  { %3266 = vmatpush3.msra.mxu1 %v2009_v30  ;;  %1927 = vmatprep.subr.bf16.mxu0 %v3816_v29  ;;  %v3224_v29 = vcombine.low %v4542_v22, %v4542_v22  ;;  %v59_v30 = vrot.slane %v54_v25, %v4738_v19 }
  0xc9   :  { %3267 = vmatprep.subr.mxu1 %v2024_v31  ;;  %v329_v31 = vrot.slane %v2878_v26, %v4738_v19 }
  0xca   :  { %3268 = vmatpush3.msra.mxu1 %v2008_v32  ;;  %v2075_v32 = vld [vmem:[%s5376_s3 + $0x278] sm:$0xff] }
  0xcb   :  { %3269 = vmatprep.subr.mxu1 %v2023_v34  ;;  %1928 = vmatpush1.bf16.msra.mxu0 %v3814_v33  ;;  %v63_v33 = vrot.slane %v54_v25, %v4747_v27  ;;  %v333_v34 = vrot.slane %v2878_v26, %v4747_v27  ;;  %v2079_v25 = vld [vmem:[%s5376_s3 + $0x298] sm:$0xff] }
  0xcc   :  { %3270 = vmatpush3.msra.mxu1 %v2007_v36  ;;  %1929 = vmatprep.subr.bf16.mxu0 %v3819_v35  ;;  %v2090_v35 = vld [vmem:[%s5376_s3 + $0x2f0] sm:$0xff] }
  0xcd   :  { %3271 = vmatprep.subr.mxu1 %v2022_v37  ;;  %v2074_v37 = vld [vmem:[%s5376_s3 + $0x270] sm:$0xff] }
  0xce   :  { %3272 = vmatpush3.msra.mxu1 %v2006_v38 }
  0xcf   :  { %3273 = vmatprep.subr.mxu1 %v2021_v40  ;;  %1930 = vmatpush1.bf16.msra.mxu0 %v3817_v39  ;;  %v2089_v40 = vld [vmem:[%s5376_s3 + $0x2e8] sm:$0xff] }
  0xd0   :  { %3274 = vmatpush3.msra.mxu1 %v2005_v42  ;;  %1931 = vmatprep.subr.bf16.mxu0 %v3822_v41 }
  0xd1   :  { %3275 = vmatprep.subr.mxu1 %v2020_v43  ;;  %v2073_v43 = vld [vmem:[%s5376_s3 + $0x268] sm:$0xff] }
  0xd2   :  { %3276 = vmatpush3.msra.mxu1 %v2004_v44 }
  0xd3   :  { %3277 = vmatprep.subr.mxu1 %v2019_v46  ;;  %1932 = vmatpush1.bf16.msra.mxu0 %v3820_v45 }
  0xd4   :  { %3278 = vmatpush3.msra.mxu1 %v2003_v48  ;;  %1933 = vmatprep.subr.bf16.mxu0 %v3825_v47  ;;  %v2088_v48 = vld [vmem:[%s5376_s3 + $0x2e0] sm:$0xff] }
  0xd5   :  { %3279 = vmatprep.subr.mxu1 %v2018_v49 }
  0xd6   :  { %3280 = vmatpush3.msra.mxu1 %v2002_v50 }
  0xd7   :  { %3281 = vmatprep.subr.mxu1 %v2017_v52  ;;  %1934 = vmatpush1.bf16.msra.mxu0 %v3823_v51  ;;  %v2072_v51 = vld [vmem:[%s5376_s3 + $0x260] sm:$0xff] }
  0xd8   :  { %3282 = vmatpush3.msra.mxu1 %v2001_v54  ;;  %1935 = vmatprep.subr.bf16.mxu0 %v3828_v53 }
  0xd9   :  { %3283 = vmatprep.subr.mxu1 %v2016_v55 }
  0xda   :  { %3284 = vmatpush3.msra.mxu1 %v2000_v56  ;;  %v2087_v56 = vld [vmem:[%s5376_s3 + $0x2d8] sm:$0xff] }
  0xdb   :  { %3285 = vmatprep.subr.mxu1 %v2015_v58  ;;  %1936 = vmatpush1.bf16.msra.mxu0 %v3826_v57 }
  0xdc   :  { %3286 = vmatpush3.msra.mxu1 %v1999_v60  ;;  %1937 = vmatprep.subr.bf16.mxu0 %v3831_v59  ;;  %v2071_v59 = vld [vmem:[%s5376_s3 + $0x258] sm:$0xff] }
  0xdd   :  { %3287 = vmatprep.subr.mxu1 %v2014_v61 }
  0xde   :  { %3288 = vmatpush3.msra.mxu1 %v1998_v62 }
  0xdf   :  { %3289 = vmatprep.subr.mxu1 %v2013_v0  ;;  %1938 = vmatpush1.bf16.msra.mxu0 %v3829_v63  ;;  %v2086_v0 = vld [vmem:[%s5376_s3 + $0x2d0] sm:$0xff] }
  0xe0   :  { %3290 = vmatpush3.msra.mxu1 %v1997_v2  ;;  %1939 = vmatprep.subr.bf16.mxu0 %v3834_v1  ;;  %v2070_v1 = vld [vmem:[%s5376_s3 + $0x250] sm:$0xff] }
  0xe1   :  { %3291 = vmatprep.subr.mxu1 %v2012_v3 }
  0xe2   :  { %3292 = vmatpush3.msra.mxu1 %v1996_v4  ;;  %v2085_v4 = vld [vmem:[%s5376_s3 + $0x2c8] sm:$0xff] }
  0xe3   :  { %3296 = vmatprep.subr.mxu1 %v2059_v6  ;;  %1940 = vmatpush2.bf16.msra.mxu0 %v3832_v5  ;;  %v2069_v5 = vld [vmem:[%s5376_s3 + $0x248] sm:$0xff] }
  0xe4   :  { %1941 = vmatprep.subr.bf16.mxu0 %v3837_v7  ;;  %v3883_v7 = vmov 1983009808  }
  0xe7   :  { %1942 = vmatpush2.bf16.msra.mxu0 %v3835_v8  ;;  %v2233_v8 = vunpack.c.l.s4 %v3883_v7  ;;  %v2107_v7 = vld [vmem:[%s5376_s3 + $0x378] sm:$0xff] }
  0xe8   :  { %1943 = vmatprep.subr.bf16.mxu0 %v3840_v9  ;;  %v2084_v9 = vld [vmem:[%s5376_s3 + $0x2c0] sm:$0xff] }
  0xeb   :  { %1944 = vmatpush2.bf16.msra.mxu0 %v3838_v10  ;;  %v2068_v10 = vld [vmem:[%s5376_s3 + $0x240] sm:$0xff] }
  0xec   :  { %1945 = vmatprep.subr.bf16.mxu0 %v3843_v11 }
  0xef   :  { %1946 = vmatpush2.bf16.msra.mxu0 %v3841_v12  ;;  %v2083_v12 = vld [vmem:[%s5376_s3 + $0x2b8] sm:$0xff] }
  0xf0   :  { %1947 = vmatprep.subr.bf16.mxu0 %v3846_v13  ;;  %v2067_v13 = vld [vmem:[%s5376_s3 + $0x238] sm:$0xff] }
  0xf3   :  { %1948 = vmatpush2.bf16.msra.mxu0 %v3844_v14  ;;  %v2234_v14 = vunpack.c.0.s8 %v2233_v8  ;;  %v2947_v8 = vld [vmem:[%s5375_s2 + $0x4] sm:$0x3] }
  0xf4   :  { %1949 = vmatprep.subr.bf16.mxu0 %v3849_v15  ;;  %v2082_v15 = vld [vmem:[%s5376_s3 + $0x2b0] sm:$0xff] }
  0xf7   :  { %1950 = vmatpush2.bf16.msra.mxu0 %v3847_v16  ;;  %v2066_v16 = vld [vmem:[%s5376_s3 + $0x230] sm:$0xff] }
  0xf8   :  { %1951 = vmatprep.subr.bf16.mxu0 %v3852_v20  ;;  %v2065_v20 = vld [vmem:[%s5376_s3 + $0x228] sm:$0xff] }
  0xfb   :  { %1952 = vmatpush2.bf16.msra.mxu0 %v3850_v21  ;;  %v4822_v21 = vsub.s32 %v2234_v14, %v4729_v23  ;;  %v2063_v23 = vld [vmem:[%s5376_s3 + $0x218] sm:$0xff]  ;;  %v2121_v14 = vld [vmem:[%s5376_s3 + $0x3e8] sm:$0xff] }
  0xfc   :  { %1953 = vmatprep.subr.bf16.mxu0 %v3855_v24  ;;  %v2080_v24 = vld [vmem:[%s5376_s3 + $0x2a0] sm:$0xff] }
  0xff   :  { %1954 = vmatpush2.bf16.msra.mxu0 %v3853_v18  ;;  %v2064_v18 = vld [vmem:[%s5376_s3 + $0x220] sm:$0xff] }
 0x100   :  { %3331 = vmatprep.subr.mxu0 %v2091_v28 }
 0x102   :  { %v267_v36 = vpop.f32.mrf.mxu0  ;;  %1956 = vmatmul.mubr.bf16.vlgmr.msra.gmra.mxu0 %v3224_v29 }
 0x103   :  { %v537_v22 = vpop.f32.mrf.mxu1  ;;  %v268_v38 = vadd.f32 %v267_v36, %v59_v30  ;;  %3332 = vmatpush3.msra.mxu0 %v2075_v32  ;;  %v2078_v30 = vld [vmem:[%s5376_s3 + $0x290] sm:$0xff] }
 0x104   :  { %v538_v39 = vadd.f32 %v537_v22, %v329_v31  ;;  %v269_v41 = vpop.f32.mrf.mxu0  ;;  %3333 = vmatprep.subr.mxu0 %v2090_v35  ;;  %v2062_v31 = vld [vmem:[%s5376_s3 + $0x210] sm:$0xff]  ;;  %v2043_v35 = vld [vmem:[%s5376_s3 + $0x178] sm:$0xff] }
 0x105   :  { %v539_v42 = vpop.f32.mrf.mxu1  ;;  %v274_v44 = vmax.f32 %v268_v38, 0.0  ;;  %v270_v46 = vadd.f32 %v269_v41, %v63_v33  ;;  %3334 = vmatpush3.msra.mxu0 %v2074_v37  ;;  %v2058_v36 = vld [vmem:[%s5376_s3 + $0x1f0] sm:$0xff]  ;;  %v2061_v37 = vld [vmem:[%s5376_s3 + $0x208] sm:$0xff]  ;;  %v2060_v41 = vld [vmem:[%s5376_s3 + $0x200] sm:$0xff] }
 0x106   :  { %v544_v45 = vmax.f32 %v538_v39, 0.0  ;;  %v540_v47 = vadd.f32 %v539_v42, %v333_v34  ;;  %v271_v49 = vpop.f32.mrf.mxu0  ;;  %3335 = vmatprep.subr.mxu0 %v2089_v40  ;;  %v2077_v34 = vld [vmem:[%s5376_s3 + $0x288] sm:$0xff]  ;;  %v2042_v38 = vld [vmem:[%s5376_s3 + $0x170] sm:$0xff]  ;;  %v2076_v39 = vld [vmem:[%s5376_s3 + $0x280] sm:$0xff] }
 0x107   :  { %v541_v50 = vpop.f32.mrf.mxu1  ;;  %v275_v54 = vmax.f32 %v270_v46, 0.0  ;;  %3336 = vmatpush3.msra.mxu0 %v2073_v43  ;;  %v2057_v40 = vld [vmem:[%s5376_s3 + $0x1e8] sm:$0xff]  ;;  %v2155_v43 = vld [vmem:[%s5376_s3 + $0x4f8] sm:$0xff]  ;;  %v2038_v49 = vld [vmem:[%s5376_s3 + $0x150] sm:$0xff] }
 0x108   :  { %v548_v52 = vrot.slane %v544_v45, 2  ;;  %v554_v53 = vrot.slane %v544_v45, 4  ;;  %v545_v55 = vmax.f32 %v540_v47, 0.0  ;;  %v272_v57 = vpop.f32.mrf.mxu0  ;;  %3337 = vmatprep.subr.mxu0 %v2088_v48  ;;  %v2041_v42 = vld [vmem:[%s5376_s3 + $0x168] sm:$0xff]  ;;  %v2055_v46 = vld [vmem:[%s5376_s3 + $0x1d8] sm:$0xff]  ;;  %v2054_v48 = vld [vmem:[%s5376_s3 + $0x1d0] sm:$0xff] }
 0x109   :  { %v542_v58 = vpop.f32.mrf.mxu1  ;;  %v278_v61 = vcombine.low %v274_v44, %v275_v54  ;;  %3338 = vmatpush3.msra.mxu0 %v2072_v51  ;;  %v2056_v44 = vld [vmem:[%s5376_s3 + $0x1e0] sm:$0xff]  ;;  %v2039_v47 = vld [vmem:[%s5376_s3 + $0x158] sm:$0xff]  ;;  %v2053_v50 = vld [vmem:[%s5376_s3 + $0x1c8] sm:$0xff] }
 0x10a   :  { %v552_v60 = vadd.f32 %v548_v52, %v544_v45  ;;  %v549_v62 = vrot.slane %v545_v55, 2  ;;  %v555_v63 = vrot.slane %v545_v55, 4  ;;  %3339 = vmatprep.subr.mxu0 %v2087_v56  ;;  %v2040_v45 = vld [vmem:[%s5376_s3 + $0x160] sm:$0xff]  ;;  %v2037_v51 = vld [vmem:[%s5376_s3 + $0x148] sm:$0xff]  ;;  %v2051_v54 = vld [vmem:[%s5376_s3 + $0x1b8] sm:$0xff] }
 0x10b   :  { %2844 = vst.sshfl [vmem:[#allocation2] sm:$0x33 pattern:$0x76325410] %v278_v61  ;;  %3340 = vmatpush3.msra.mxu0 %v2071_v59  ;;  %v2052_v52 = vld [vmem:[%s5376_s3 + $0x1c0] sm:$0xff]  ;;  %v2050_v56 = vld [vmem:[%s5376_s3 + $0x1b0] sm:$0xff] }
 0x10c   :  { %v558_v2 = vadd.f32 %v554_v53, %v552_v60  ;;  %v553_v3 = vadd.f32 %v549_v62, %v545_v55  ;;  %3341 = vmatprep.subr.mxu0 %v2086_v0  ;;  %v2036_v53 = vld [vmem:[%s5376_s3 + $0x140] sm:$0xff]  ;;  %v2035_v55 = vld [vmem:[%s5376_s3 + $0x138] sm:$0xff]  ;;  %v2034_v57 = vld [vmem:[%s5376_s3 + $0x130] sm:$0xff] }
 0x10d   :  { %3342 = vmatpush3.msra.mxu0 %v2070_v1  ;;  %v2049_v58 = vld [vmem:[%s5376_s3 + $0x1a8] sm:$0xff]  ;;  %v2048_v60 = vld [vmem:[%s5376_s3 + $0x1a0] sm:$0xff]  ;;  %v2047_v62 = vld [vmem:[%s5376_s3 + $0x198] sm:$0xff] }
 0x10e   :  { %v559_v6 = vadd.f32 %v555_v63, %v553_v3  ;;  %3343 = vmatprep.subr.mxu0 %v2085_v4  ;;  %v2033_v59 = vld [vmem:[%s5376_s3 + $0x128] sm:$0xff]  ;;  %v2032_v61 = vld [vmem:[%s5376_s3 + $0x120] sm:$0xff]  ;;  %v2031_v63 = vld [vmem:[%s5376_s3 + $0x118] sm:$0xff] }
 0x10f   :  { %3344 = vmatpush3.msra.mxu0 %v2069_v5  ;;  %v2046_v0 = vld [vmem:[%s5376_s3 + $0x190] sm:$0xff]  ;;  %v2029_v3 = vld [vmem:[%s5376_s3 + $0x108] sm:$0xff]  ;;  %v2044_v4 = vld [vmem:[%s5376_s3 + $0x180] sm:$0xff] }
 0x110   :  { %v562_v11 = vcombine.low %v558_v2, %v559_v6  ;;  %3345 = vmatprep.subr.mxu0 %v2084_v9  ;;  %v2030_v1 = vld [vmem:[%s5376_s3 + $0x110] sm:$0xff]  ;;  %v2045_v2 = vld [vmem:[%s5376_s3 + $0x188] sm:$0xff]  ;;  %v2028_v5 = vld [vmem:[%s5376_s3 + $0x100] sm:$0xff] }
 0x111   :  { %3346 = vmatpush3.msra.mxu0 %v2068_v10  ;;  %v2123_v6 = vld [vmem:[%s5376_s3 + $0x3f8] sm:$0xff]  ;;  %v3016_v9 = vld [vmem:[%s5375_s2 + $0x6] sm:$0x3]  ;;  %v2122_v10 = vld [vmem:[%s5376_s3 + $0x3f0] sm:$0xff] }
 0x112   :  { %2913 = vst.sshfl [vmem:[#allocation2 + $0x4] sm:$0x33 pattern:$0x76325410] %v562_v11  ;;  %3347 = vmatprep.subr.mxu0 %v2083_v12  ;;  %v2106_v11 = vld [vmem:[%s5376_s3 + $0x370] sm:$0xff]  ;;  %v613_v12 = vrot.slane %v2947_v8, %v4738_v19 }
 0x113   :  { %3348 = vmatpush3.msra.mxu0 %v2067_v13  ;;  %v897_v13 = vrot.slane %v3016_v9, %v4738_v19 }
 0x114   :  { %3349 = vmatprep.subr.mxu0 %v2082_v15  ;;  %v2105_v15 = vld [vmem:[%s5376_s3 + $0x368] sm:$0xff] }
 0x115   :  { %3350 = vmatpush3.msra.mxu0 %v2066_v16  ;;  %v617_v16 = vrot.slane %v2947_v8, %v4747_v27  ;;  %v2096_v8 = vld [vmem:[%s5376_s3 + $0x320] sm:$0xff] }
 0x116   :  { %3351 = vmatprep.subr.mxu0 %v2081_v17  ;;  %v901_v17 = vrot.slane %v3016_v9, %v4747_v27  ;;  %v2111_v9 = vld [vmem:[%s5376_s3 + $0x398] sm:$0xff] }
 0x117   :  { %3352 = vmatpush3.msra.mxu0 %v2065_v20  ;;  %v2120_v20 = vld [vmem:[%s5376_s3 + $0x3e0] sm:$0xff] }
 0x118   :  { %3353 = vmatprep.subr.mxu0 %v2080_v24 }
 0x119   :  { %v1992_v26 = vld [vmem:[#allocation2] sm:$0xff]  ;;  %3354 = vmatpush3.msra.mxu0 %v2064_v18 }
 0x11a   :  { %v2238_v28 = vrot.slane %v1992_v26, %v4822_v21  ;;  %v2231_v29 = vcombine.high %v1992_v26, %v1992_v26  ;;  %3355 = vmatprep.subr.mxu0 %v2079_v25  ;;  %v2104_v25 = vld [vmem:[%s5376_s3 + $0x360] sm:$0xff] }
 0x11b   :  { %3356 = vmatpush3.msra.mxu0 %v2063_v23 }
 0x11c   :  { %v2246_v32 = vcombine.high %v2238_v28, %v2238_v28  ;;  %v4844_v33 = vrot.slane %v2231_v29, %v4822_v21  ;;  %3357 = vmatprep.subr.mxu0 %v2078_v30 }
 0x11d   :  { %3358 = vmatpush3.msra.mxu0 %v2062_v31  ;;  %v2103_v31 = vld [vmem:[%s5376_s3 + $0x358] sm:$0xff] }
 0x11e   :  { %2368 = vmatprep.mubr.f32.mxu1 %v2246_v32  ;;  %v2247_v22 = vcombine.high %v4844_v33, %v4844_v33  ;;  %3359 = vmatprep.subr.mxu0 %v2077_v34 }
 0x11f   :  { %2369 = vmatmul.mubr.f32.vlgmr.msra.gmra.mxu1 %v2238_v28  ;;  %3360 = vmatpush3.msra.mxu0 %v2061_v37  ;;  %v2119_v28 = vld [vmem:[%s5376_s3 + $0x3d8] sm:$0xff]  ;;  %v2102_v37 = vld [vmem:[%s5376_s3 + $0x350] sm:$0xff] }
 0x120   :  { %3297 = vmatpush3.msra.mxu1 %v2043_v35  ;;  %2438 = vmatprep.mubr.f32.mxu1 %v2247_v22 }
 0x121   :  { %3298 = vmatprep.subr.mxu1 %v2058_v36  ;;  %3361 = vmatprep.subr.mxu0 %v2076_v39  ;;  %v2118_v36 = vld [vmem:[%s5376_s3 + $0x3d0] sm:$0xff] }
 0x122   :  { %3299 = vmatpush3.msra.mxu1 %v2042_v38  ;;  %3362 = vmatpush3.msra.mxu0 %v2060_v41  ;;  %v2117_v41 = vld [vmem:[%s5376_s3 + $0x3c8] sm:$0xff] }
 0x123   :  { %3300 = vmatprep.subr.mxu1 %v2057_v40  ;;  %3401 = vmatprep.subr.mxu0 %v2155_v43 }
 0x124   :  { %3301 = vmatpush3.msra.mxu1 %v2041_v42 }
 0x125   :  { %3302 = vmatprep.subr.mxu1 %v2056_v44 }
 0x126   :  { %3303 = vmatpush3.msra.mxu1 %v2040_v45 }
 0x127   :  { %3304 = vmatprep.subr.mxu1 %v2055_v46  ;;  %v2101_v46 = vld [vmem:[%s5376_s3 + $0x348] sm:$0xff] }
 0x128   :  { %3305 = vmatpush3.msra.mxu1 %v2039_v47 }
 0x129   :  { %3306 = vmatprep.subr.mxu1 %v2054_v48 }
 0x12a   :  { %3307 = vmatpush3.msra.mxu1 %v2038_v49 }
 0x12b   :  { %3308 = vmatprep.subr.mxu1 %v2053_v50  ;;  %v2116_v50 = vld [vmem:[%s5376_s3 + $0x3c0] sm:$0xff] }
 0x12c   :  { %3309 = vmatpush3.msra.mxu1 %v2037_v51 }
 0x12d   :  { %3310 = vmatprep.subr.mxu1 %v2052_v52 }
 0x12e   :  { %3311 = vmatpush3.msra.mxu1 %v2036_v53 }
 0x12f   :  { %3312 = vmatprep.subr.mxu1 %v2051_v54 }
 0x130   :  { %3313 = vmatpush3.msra.mxu1 %v2035_v55  ;;  %v2100_v55 = vld [vmem:[%s5376_s3 + $0x340] sm:$0xff] }
 0x131   :  { %3314 = vmatprep.subr.mxu1 %v2050_v56  ;;  %v2115_v56 = vld [vmem:[%s5376_s3 + $0x3b8] sm:$0xff] }
 0x132   :  { %3315 = vmatpush3.msra.mxu1 %v2034_v57 }
 0x133   :  { %3316 = vmatprep.subr.mxu1 %v2049_v58 }
 0x134   :  { %3317 = vmatpush3.msra.mxu1 %v2033_v59 }
 0x135   :  { %3318 = vmatprep.subr.mxu1 %v2048_v60 }
 0x136   :  { %3319 = vmatpush3.msra.mxu1 %v2032_v61  ;;  %v2099_v61 = vld [vmem:[%s5376_s3 + $0x338] sm:$0xff] }
 0x137   :  { %3320 = vmatprep.subr.mxu1 %v2047_v62  ;;  %v2114_v62 = vld [vmem:[%s5376_s3 + $0x3b0] sm:$0xff] }
 0x138   :  { %3321 = vmatpush3.msra.mxu1 %v2031_v63 }
 0x139   :  { %3322 = vmatprep.subr.mxu1 %v2046_v0 }
 0x13a   :  { %3323 = vmatpush3.msra.mxu1 %v2030_v1 }
 0x13b   :  { %3324 = vmatprep.subr.mxu1 %v2045_v2  ;;  %v2098_v2 = vld [vmem:[%s5376_s3 + $0x330] sm:$0xff] }
 0x13c   :  { %3325 = vmatpush3.msra.mxu1 %v2029_v3  ;;  %v2113_v3 = vld [vmem:[%s5376_s3 + $0x3a8] sm:$0xff] }
 0x13d   :  { %3326 = vmatprep.subr.mxu1 %v2044_v4 }
 0x13e   :  { %3327 = vmatpush3.msra.mxu1 %v2028_v5 }
 0x13f   :  { %2439 = vmatmul.mubr.f32.vlgmr.msra.gmra.mxu1 %v4844_v33  ;;  %3366 = vmatprep.subr.mxu1 %v2123_v6  ;;  %v2097_v6 = vld [vmem:[%s5376_s3 + $0x328] sm:$0xff] }
 0x140   :  { %3367 = vmatpush3.msra.mxu1 %v2107_v7  ;;  %v2112_v7 = vld [vmem:[%s5376_s3 + $0x3a0] sm:$0xff] }
 0x141   :  { %3368 = vmatprep.subr.mxu1 %v2122_v10  ;;  %v2095_v10 = vld [vmem:[%s5376_s3 + $0x318] sm:$0xff] }
 0x142   :  { %3369 = vmatpush3.msra.mxu1 %v2106_v11  ;;  %v821_v24 = vpop.f32.mrf.mxu0  ;;  %v2110_v11 = vld [vmem:[%s5376_s3 + $0x390] sm:$0xff] }
 0x143   :  { %v1105_v18 = vpop.f32.mrf.mxu1  ;;  %3370 = vmatprep.subr.mxu1 %v2121_v14  ;;  %v822_v26 = vadd.f32 %v821_v24, %v613_v12  ;;  %v2094_v12 = vld [vmem:[%s5376_s3 + $0x310] sm:$0xff]  ;;  %v2093_v14 = vld [vmem:[%s5376_s3 + $0x308] sm:$0xff] }
 0x144   :  { %v1106_v23 = vadd.f32 %v1105_v18, %v897_v13  ;;  %3371 = vmatpush3.msra.mxu1 %v2105_v15  ;;  %v823_v29 = vpop.f32.mrf.mxu0  ;;  %v2109_v13 = vld [vmem:[%s5376_s3 + $0x388] sm:$0xff]  ;;  %v2187_v18 = vld [vmem:[%s5376_s3 + $0x5f8] sm:$0xff] }
 0x145   :  { %v1107_v30 = vpop.f32.mrf.mxu1  ;;  %3372 = vmatprep.subr.mxu1 %v2120_v20  ;;  %v828_v32 = vmax.f32 %v822_v26, 0.0  ;;  %v824_v34 = vadd.f32 %v823_v29, %v617_v16  ;;  %v2108_v16 = vld [vmem:[%s5376_s3 + $0x380] sm:$0xff]  ;;  %v2154_v29 = vld [vmem:[%s5376_s3 + $0x4f0] sm:$0xff] }
 0x146   :  { %v1112_v33 = vmax.f32 %v1106_v23, 0.0  ;;  %v1108_v35 = vadd.f32 %v1107_v30, %v901_v17  ;;  %3373 = vmatpush3.msra.mxu1 %v2104_v25  ;;  %v825_v22 = vpop.f32.mrf.mxu0  ;;  %v2092_v20 = vld [vmem:[%s5376_s3 + $0x300] sm:$0xff]  ;;  %v2139_v23 = vld [vmem:[%s5376_s3 + $0x478] sm:$0xff]  ;;  %v2138_v30 = vld [vmem:[%s5376_s3 + $0x470] sm:$0xff] }
 0x147   :  { %3374 = vmatprep.subr.mxu1 %v2119_v28  ;;  %v1109_v38 = vpop.f32.mrf.mxu1  ;;  %v832_v39 = vrot.slane %v828_v32, 2  ;;  %v829_v43 = vmax.f32 %v824_v34, 0.0  ;;  %v838_v48 = vrot.slane %v828_v32, 4  ;;  %v2137_v34 = vld [vmem:[%s5376_s3 + $0x468] sm:$0xff] }
 0x148   :  { %v1116_v40 = vrot.slane %v1112_v33, 2  ;;  %3375 = vmatpush3.msra.mxu1 %v2103_v31  ;;  %v1122_v42 = vrot.slane %v1112_v33, 4  ;;  %v1113_v44 = vmax.f32 %v1108_v35, 0.0  ;;  %v826_v45 = vpop.f32.mrf.mxu0  ;;  %v2171_v31 = vld [vmem:[%s5376_s3 + $0x578] sm:$0xff]  ;;  %v2170_v35 = vld [vmem:[%s5376_s3 + $0x570] sm:$0xff]  ;;  %v2185_v22 = vld [vmem:[%s5376_s3 + $0x5e8] sm:$0xff] }
 0x149   :  { %3376 = vmatprep.subr.mxu1 %v2118_v36  ;;  %v1110_v47 = vpop.f32.mrf.mxu1  ;;  %v836_v51 = vadd.f32 %v832_v39, %v828_v32  ;;  %v833_v52 = vrot.slane %v829_v43, 2  ;;  %v839_v59 = vrot.slane %v829_v43, 4  ;;  %v2153_v32 = vld [vmem:[%s5376_s3 + $0x4e8] sm:$0xff]  ;;  %v2152_v36 = vld [vmem:[%s5376_s3 + $0x4e0] sm:$0xff]  ;;  %v2151_v39 = vld [vmem:[%s5376_s3 + $0x4d8] sm:$0xff] }
 0x14a   :  { %v1120_v49 = vadd.f32 %v1116_v40, %v1112_v33  ;;  %3377 = vmatpush3.msra.mxu1 %v2102_v37  ;;  %v1117_v53 = vrot.slane %v1113_v44, 2  ;;  %v1123_v54 = vrot.slane %v1113_v44, 4  ;;  %v2186_v33 = vld [vmem:[%s5376_s3 + $0x5f0] sm:$0xff]  ;;  %v2136_v37 = vld [vmem:[%s5376_s3 + $0x460] sm:$0xff]  ;;  %v2169_v38 = vld [vmem:[%s5376_s3 + $0x568] sm:$0xff] }
 0x14b   :  { %3378 = vmatprep.subr.mxu1 %v2117_v41  ;;  %v837_v58 = vadd.f32 %v833_v52, %v829_v43  ;;  %v842_v63 = vadd.f32 %v838_v48, %v836_v51  ;;  %v2184_v40 = vld [vmem:[%s5376_s3 + $0x5e0] sm:$0xff]  ;;  %v2135_v41 = vld [vmem:[%s5376_s3 + $0x458] sm:$0xff]  ;;  %v2150_v43 = vld [vmem:[%s5376_s3 + $0x4d0] sm:$0xff] }
 0x14c   :  { %3379 = vmatpush3.msra.mxu1 %v2101_v46  ;;  %v1126_v57 = vadd.f32 %v1122_v42, %v1120_v49  ;;  %v1121_v60 = vadd.f32 %v1117_v53, %v1113_v44  ;;  %v2168_v42 = vld [vmem:[%s5376_s3 + $0x560] sm:$0xff]  ;;  %v2183_v44 = vld [vmem:[%s5376_s3 + $0x5d8] sm:$0xff]  ;;  %v2134_v45 = vld [vmem:[%s5376_s3 + $0x450] sm:$0xff] }
 0x14d   :  { %3380 = vmatprep.subr.mxu1 %v2116_v50  ;;  %v843_v0 = vadd.f32 %v839_v59, %v837_v58  ;;  %v2167_v46 = vld [vmem:[%s5376_s3 + $0x558] sm:$0xff]  ;;  %v2149_v47 = vld [vmem:[%s5376_s3 + $0x4c8] sm:$0xff]  ;;  %v2182_v48 = vld [vmem:[%s5376_s3 + $0x5d0] sm:$0xff] }
 0x14e   :  { %3381 = vmatpush3.msra.mxu1 %v2100_v55  ;;  %v1127_v1 = vadd.f32 %v1123_v54, %v1121_v60  ;;  %v2133_v49 = vld [vmem:[%s5376_s3 + $0x448] sm:$0xff]  ;;  %v2166_v50 = vld [vmem:[%s5376_s3 + $0x550] sm:$0xff]  ;;  %v2148_v51 = vld [vmem:[%s5376_s3 + $0x4c0] sm:$0xff] }
 0x14f   :  { %3382 = vmatprep.subr.mxu1 %v2115_v56  ;;  %v846_v4 = vcombine.low %v842_v63, %v843_v0  ;;  %v2181_v52 = vld [vmem:[%s5376_s3 + $0x5c8] sm:$0xff]  ;;  %v2132_v53 = vld [vmem:[%s5376_s3 + $0x440] sm:$0xff]  ;;  %v2147_v55 = vld [vmem:[%s5376_s3 + $0x4b8] sm:$0xff] }
 0x150   :  { %3383 = vmatpush3.msra.mxu1 %v2099_v61  ;;  %v1130_v5 = vcombine.low %v1126_v57, %v1127_v1  ;;  %v2165_v54 = vld [vmem:[%s5376_s3 + $0x548] sm:$0xff]  ;;  %v2180_v56 = vld [vmem:[%s5376_s3 + $0x5c0] sm:$0xff]  ;;  %v2131_v57 = vld [vmem:[%s5376_s3 + $0x438] sm:$0xff] }
 0x151   :  { %3384 = vmatprep.subr.mxu1 %v2114_v62  ;;  %2982 = vst.sshfl [vmem:[#allocation2 + $0x8] sm:$0x33 pattern:$0x76325410] %v846_v4  ;;  %v2164_v58 = vld [vmem:[%s5376_s3 + $0x540] sm:$0xff]  ;;  %v2146_v59 = vld [vmem:[%s5376_s3 + $0x4b0] sm:$0xff] }
 0x152   :  { %3385 = vmatpush3.msra.mxu1 %v2098_v2  ;;  %3051 = vst.sshfl [vmem:[#allocation2 + $0xc] sm:$0x33 pattern:$0x76325410] %v1130_v5  ;;  %v2179_v60 = vld [vmem:[%s5376_s3 + $0x5b8] sm:$0xff]  ;;  %v2130_v61 = vld [vmem:[%s5376_s3 + $0x430] sm:$0xff] }
 0x153   :  { %3386 = vmatprep.subr.mxu1 %v2113_v3  ;;  %v2163_v62 = vld [vmem:[%s5376_s3 + $0x538] sm:$0xff]  ;;  %v2145_v63 = vld [vmem:[%s5376_s3 + $0x4a8] sm:$0xff]  ;;  %v2178_v0 = vld [vmem:[%s5376_s3 + $0x5b0] sm:$0xff] }
 0x154   :  { %3387 = vmatpush3.msra.mxu1 %v2097_v6  ;;  %v2129_v1 = vld [vmem:[%s5376_s3 + $0x428] sm:$0xff]  ;;  %v2162_v2 = vld [vmem:[%s5376_s3 + $0x530] sm:$0xff]  ;;  %v2144_v3 = vld [vmem:[%s5376_s3 + $0x4a0] sm:$0xff] }
 0x155   :  { %3388 = vmatprep.subr.mxu1 %v2112_v7  ;;  %v2177_v4 = vld [vmem:[%s5376_s3 + $0x5a8] sm:$0xff]  ;;  %v2128_v5 = vld [vmem:[%s5376_s3 + $0x420] sm:$0xff]  ;;  %v2143_v7 = vld [vmem:[%s5376_s3 + $0x498] sm:$0xff] }
 0x156   :  { %3389 = vmatpush3.msra.mxu1 %v2096_v8  ;;  %v2161_v6 = vld [vmem:[%s5376_s3 + $0x528] sm:$0xff]  ;;  %v2176_v8 = vld [vmem:[%s5376_s3 + $0x5a0] sm:$0xff] }
 0x157   :  { %3390 = vmatprep.subr.mxu1 %v2111_v9  ;;  %v2127_v9 = vld [vmem:[%s5376_s3 + $0x418] sm:$0xff] }
 0x158   :  { %3391 = vmatpush3.msra.mxu1 %v2095_v10  ;;  %v2160_v10 = vld [vmem:[%s5376_s3 + $0x520] sm:$0xff] }
 0x159   :  { %3392 = vmatprep.subr.mxu1 %v2110_v11  ;;  %v1993_v15 = vld [vmem:[#allocation2 + $0x8] sm:$0xff]  ;;  %v2142_v11 = vld [vmem:[%s5376_s3 + $0x490] sm:$0xff] }
 0x15a   :  { %3393 = vmatpush3.msra.mxu1 %v2094_v12  ;;  %v2255_v17 = vrot.slane %v1993_v15, %v4822_v21  ;;  %v2248_v24 = vcombine.high %v1993_v15, %v1993_v15  ;;  %v2175_v12 = vld [vmem:[%s5376_s3 + $0x598] sm:$0xff]  ;;  %v2141_v15 = vld [vmem:[%s5376_s3 + $0x488] sm:$0xff] }
 0x15b   :  { %3394 = vmatprep.subr.mxu1 %v2109_v13  ;;  %v2126_v13 = vld [vmem:[%s5376_s3 + $0x410] sm:$0xff] }
 0x15c   :  { %3395 = vmatpush3.msra.mxu1 %v2093_v14  ;;  %v2263_v25 = vcombine.high %v2255_v17, %v2255_v17  ;;  %v2262_v26 = vrot.slane %v2248_v24, %v4822_v21  ;;  %v2159_v14 = vld [vmem:[%s5376_s3 + $0x518] sm:$0xff]  ;;  %v2140_v24 = vld [vmem:[%s5376_s3 + $0x480] sm:$0xff] }
 0x15d   :  { %3396 = vmatprep.subr.mxu1 %v2108_v16  ;;  %v2174_v16 = vld [vmem:[%s5376_s3 + $0x590] sm:$0xff] }
 0x15e   :  { %3397 = vmatpush3.msra.mxu1 %v2092_v20  ;;  %2508 = vmatprep.mubr.f32.mxu0 %v2263_v25  ;;  %v2264_v28 = vcombine.high %v2262_v26, %v2262_v26  ;;  %v2158_v20 = vld [vmem:[%s5376_s3 + $0x510] sm:$0xff]  ;;  %v3085_v25 = vld [vmem:[%s5375_s2 + $0x8] sm:$0x3] }
 0x15f   :  { %3436 = vmatprep.subr.mxu1 %v2187_v18  ;;  %2509 = vmatmul.mubr.f32.vlgmr.msra.gmra.mxu0 %v2255_v17  ;;  %v2125_v17 = vld [vmem:[%s5376_s3 + $0x408] sm:$0xff] }
 0x160   :  { %2578 = vmatprep.mubr.f32.mxu1 %v2264_v28  ;;  %3402 = vmatpush3.msra.mxu0 %v2139_v23  ;;  %v2173_v18 = vld [vmem:[%s5376_s3 + $0x588] sm:$0xff] }
 0x161   :  { %2579 = vmatmul.mubr.f32.vlgmr.msra.gmra.mxu1 %v2262_v26  ;;  %3403 = vmatprep.subr.mxu0 %v2154_v29  ;;  %v2124_v26 = vld [vmem:[%s5376_s3 + $0x400] sm:$0xff]  ;;  %v2157_v23 = vld [vmem:[%s5376_s3 + $0x508] sm:$0xff] }
 0x162   :  { %3404 = vmatpush3.msra.mxu0 %v2138_v30  ;;  %3437 = vmatpush3.msra.mxu1 %v2171_v31  ;;  %v3154_v28 = vld [vmem:[%s5375_s2 + $0xa] sm:$0x3]  ;;  %v2172_v29 = vld [vmem:[%s5376_s3 + $0x580] sm:$0xff]  ;;  %v2219_v30 = vld [vmem:[%s5376_s3 + $0x6f8] sm:$0xff] }
 0x163   :  { %3405 = vmatprep.subr.mxu0 %v2153_v32  ;;  %3438 = vmatprep.subr.mxu1 %v2186_v33  ;;  %v2156_v31 = vld [vmem:[%s5376_s3 + $0x500] sm:$0xff]  ;;  %v1181_v32 = vrot.slane %v3085_v25, %v4738_v19  ;;  %v1465_v33 = vrot.slane %v3154_v28, %v4738_v19 }
 0x164   :  { %3406 = vmatpush3.msra.mxu0 %v2137_v34  ;;  %3439 = vmatpush3.msra.mxu1 %v2170_v35  ;;  %v1185_v34 = vrot.slane %v3085_v25, %v4747_v27  ;;  %v1469_v35 = vrot.slane %v3154_v28, %v4747_v27  ;;  %v2213_v25 = vld [vmem:[%s5376_s3 + $0x6c8] sm:$0xff]  ;;  %v2196_v28 = vld [vmem:[%s5376_s3 + $0x640] sm:$0xff] }
 0x165   :  { %3407 = vmatprep.subr.mxu0 %v2152_v36  ;;  %3440 = vmatprep.subr.mxu1 %v2185_v22 }
 0x166   :  { %3408 = vmatpush3.msra.mxu0 %v2136_v37  ;;  %3441 = vmatpush3.msra.mxu1 %v2169_v38 }
 0x167   :  { %3409 = vmatprep.subr.mxu0 %v2151_v39  ;;  %3442 = vmatprep.subr.mxu1 %v2184_v40 }
 0x168   :  { %3410 = vmatpush3.msra.mxu0 %v2135_v41  ;;  %3443 = vmatpush3.msra.mxu1 %v2168_v42 }
 0x169   :  { %3411 = vmatprep.subr.mxu0 %v2150_v43  ;;  %3444 = vmatprep.subr.mxu1 %v2183_v44 }
 0x16a   :  { %3412 = vmatpush3.msra.mxu0 %v2134_v45  ;;  %3445 = vmatpush3.msra.mxu1 %v2167_v46 }
 0x16b   :  { %3413 = vmatprep.subr.mxu0 %v2149_v47  ;;  %3446 = vmatprep.subr.mxu1 %v2182_v48 }
 0x16c   :  { %3414 = vmatpush3.msra.mxu0 %v2133_v49  ;;  %3447 = vmatpush3.msra.mxu1 %v2166_v50 }
 0x16d   :  { %3415 = vmatprep.subr.mxu0 %v2148_v51  ;;  %3448 = vmatprep.subr.mxu1 %v2181_v52 }
 0x16e   :  { %3416 = vmatpush3.msra.mxu0 %v2132_v53  ;;  %3449 = vmatpush3.msra.mxu1 %v2165_v54 }
 0x16f   :  { %3417 = vmatprep.subr.mxu0 %v2147_v55  ;;  %3450 = vmatprep.subr.mxu1 %v2180_v56 }
 0x170   :  { %3418 = vmatpush3.msra.mxu0 %v2131_v57  ;;  %3451 = vmatpush3.msra.mxu1 %v2164_v58 }
 0x171   :  { %3419 = vmatprep.subr.mxu0 %v2146_v59  ;;  %3452 = vmatprep.subr.mxu1 %v2179_v60 }
 0x172   :  { %3420 = vmatpush3.msra.mxu0 %v2130_v61  ;;  %3453 = vmatpush3.msra.mxu1 %v2163_v62 }
 0x173   :  { %3421 = vmatprep.subr.mxu0 %v2145_v63  ;;  %3454 = vmatprep.subr.mxu1 %v2178_v0 }
 0x174   :  { %3422 = vmatpush3.msra.mxu0 %v2129_v1  ;;  %3455 = vmatpush3.msra.mxu1 %v2162_v2 }
 0x175   :  { %3423 = vmatprep.subr.mxu0 %v2144_v3  ;;  %3456 = vmatprep.subr.mxu1 %v2177_v4 }
 0x176   :  { %3424 = vmatpush3.msra.mxu0 %v2128_v5  ;;  %3457 = vmatpush3.msra.mxu1 %v2161_v6 }
 0x177   :  { %3425 = vmatprep.subr.mxu0 %v2143_v7  ;;  %3458 = vmatprep.subr.mxu1 %v2176_v8 }
 0x178   :  { %3426 = vmatpush3.msra.mxu0 %v2127_v9  ;;  %3459 = vmatpush3.msra.mxu1 %v2160_v10  ;;  %v2203_v10 = vld [vmem:[%s5376_s3 + $0x678] sm:$0xff] }
 0x179   :  { %3427 = vmatprep.subr.mxu0 %v2142_v11  ;;  %3460 = vmatprep.subr.mxu1 %v2175_v12  ;;  %v2218_v12 = vld [vmem:[%s5376_s3 + $0x6f0] sm:$0xff] }
 0x17a   :  { %3428 = vmatpush3.msra.mxu0 %v2126_v13  ;;  %3461 = vmatpush3.msra.mxu1 %v2159_v14  ;;  %v2202_v13 = vld [vmem:[%s5376_s3 + $0x670] sm:$0xff]  ;;  %v2201_v14 = vld [vmem:[%s5376_s3 + $0x668] sm:$0xff] }
 0x17b   :  { %3429 = vmatprep.subr.mxu0 %v2141_v15  ;;  %3462 = vmatprep.subr.mxu1 %v2174_v16  ;;  %v2216_v15 = vld [vmem:[%s5376_s3 + $0x6e0] sm:$0xff] }
 0x17c   :  { %3430 = vmatpush3.msra.mxu0 %v2125_v17  ;;  %3463 = vmatpush3.msra.mxu1 %v2158_v20  ;;  %v2200_v16 = vld [vmem:[%s5376_s3 + $0x660] sm:$0xff]  ;;  %v2215_v17 = vld [vmem:[%s5376_s3 + $0x6d8] sm:$0xff] }
 0x17d   :  { %3431 = vmatprep.subr.mxu0 %v2140_v24  ;;  %3464 = vmatprep.subr.mxu1 %v2173_v18  ;;  %v2199_v20 = vld [vmem:[%s5376_s3 + $0x658] sm:$0xff]  ;;  %v2214_v24 = vld [vmem:[%s5376_s3 + $0x6d0] sm:$0xff] }
 0x17e   :  { %3432 = vmatpush3.msra.mxu0 %v2124_v26  ;;  %3465 = vmatpush3.msra.mxu1 %v2157_v23  ;;  %v2198_v18 = vld [vmem:[%s5376_s3 + $0x650] sm:$0xff]  ;;  %v2197_v26 = vld [vmem:[%s5376_s3 + $0x648] sm:$0xff]  ;;  %v2212_v23 = vld [vmem:[%s5376_s3 + $0x6c0] sm:$0xff] }
 0x17f   :  { %3466 = vmatprep.subr.mxu1 %v2172_v29  ;;  %3471 = vmatprep.subr.mxu0 %v2219_v30  ;;  %v2211_v29 = vld [vmem:[%s5376_s3 + $0x6b8] sm:$0xff] }
 0x180   :  { %3467 = vmatpush3.msra.mxu1 %v2156_v31  ;;  %v2195_v30 = vld [vmem:[%s5376_s3 + $0x638] sm:$0xff]  ;;  %v2210_v31 = vld [vmem:[%s5376_s3 + $0x6b0] sm:$0xff] }
 0x182   :  { %v1389_v36 = vpop.f32.mrf.mxu0 }
 0x183   :  { %v1673_v22 = vpop.f32.mrf.mxu1  ;;  %v1390_v37 = vadd.f32 %v1389_v36, %v1181_v32  ;;  %v2194_v32 = vld [vmem:[%s5376_s3 + $0x630] sm:$0xff]  ;;  %v2192_v36 = vld [vmem:[%s5376_s3 + $0x620] sm:$0xff] }
 0x184   :  { %v1674_v38 = vadd.f32 %v1673_v22, %v1465_v33  ;;  %v1391_v39 = vpop.f32.mrf.mxu0  ;;  %v2209_v33 = vld [vmem:[%s5376_s3 + $0x6a8] sm:$0xff]  ;;  %v2207_v22 = vld [vmem:[%s5376_s3 + $0x698] sm:$0xff] }
 0x185   :  { %v1675_v40 = vpop.f32.mrf.mxu1  ;;  %v1396_v41 = vmax.f32 %v1390_v37, 0.0  ;;  %v1392_v43 = vadd.f32 %v1391_v39, %v1185_v34  ;;  %v2193_v34 = vld [vmem:[%s5376_s3 + $0x628] sm:$0xff]  ;;  %v2191_v37 = vld [vmem:[%s5376_s3 + $0x618] sm:$0xff]  ;;  %v2190_v39 = vld [vmem:[%s5376_s3 + $0x610] sm:$0xff] }
 0x186   :  { %v1680_v42 = vmax.f32 %v1674_v38, 0.0  ;;  %v1676_v44 = vadd.f32 %v1675_v40, %v1469_v35  ;;  %v1393_v45 = vpop.f32.mrf.mxu0  ;;  %v2208_v35 = vld [vmem:[%s5376_s3 + $0x6a0] sm:$0xff]  ;;  %v2206_v38 = vld [vmem:[%s5376_s3 + $0x690] sm:$0xff]  ;;  %v2205_v40 = vld [vmem:[%s5376_s3 + $0x688] sm:$0xff] }
 0x187   :  { %v1677_v46 = vpop.f32.mrf.mxu1  ;;  %v1400_v47 = vrot.slane %v1396_v41, 2  ;;  %v1397_v50 = vmax.f32 %v1392_v43, 0.0  ;;  %v1406_v54 = vrot.slane %v1396_v41, 4  ;;  %v2188_v43 = vld [vmem:[%s5376_s3 + $0x600] sm:$0xff] }
 0x188   :  { %v1684_v48 = vrot.slane %v1680_v42, 2  ;;  %v1690_v49 = vrot.slane %v1680_v42, 4  ;;  %v1681_v51 = vmax.f32 %v1676_v44, 0.0  ;;  %v1394_v52 = vpop.f32.mrf.mxu0  ;;  %v3223_v44 = vld [vmem:[%s5375_s2 + $0xc] sm:$0x3] }
 0x189   :  { %v1678_v53 = vpop.f32.mrf.mxu1  ;;  %v1404_v56 = vadd.f32 %v1400_v47, %v1396_v41  ;;  %v1401_v57 = vrot.slane %v1397_v50, 2  ;;  %v1407_v62 = vrot.slane %v1397_v50, 4  ;;  %v2189_v41 = vld [vmem:[%s5376_s3 + $0x608] sm:$0xff]  ;;  %v1749_v45 = vrot.slane %v3223_v44, %v4738_v19 }
 0x18a   :  { %v1688_v55 = vadd.f32 %v1684_v48, %v1680_v42  ;;  %v1685_v58 = vrot.slane %v1681_v51, 2  ;;  %v1691_v59 = vrot.slane %v1681_v51, 4  ;;  %v2204_v42 = vld [vmem:[%s5376_s3 + $0x680] sm:$0xff]  ;;  %v1753_v46 = vrot.slane %v3223_v44, %v4747_v27 }
 0x18b   :  { %v1405_v61 = vadd.f32 %v1401_v57, %v1397_v50  ;;  %v1410_v0 = vadd.f32 %v1406_v54, %v1404_v56 }
 0x18c   :  { %v1694_v60 = vadd.f32 %v1690_v49, %v1688_v55  ;;  %v1689_v63 = vadd.f32 %v1685_v58, %v1681_v51 }
 0x18d   :  { %v1411_v1 = vadd.f32 %v1407_v62, %v1405_v61 }
 0x18e   :  { %v1695_v2 = vadd.f32 %v1691_v59, %v1689_v63 }
 0x18f   :  { %v1414_v3 = vcombine.low %v1410_v0, %v1411_v1 }
 0x190   :  { %v1698_v4 = vcombine.low %v1694_v60, %v1695_v2 }
 0x191   :  { %3120 = vst.sshfl [vmem:[#allocation2 + $0x10] sm:$0x33 pattern:$0x76325410] %v1414_v3 }
 0x192   :  { %3189 = vst.sshfl [vmem:[#allocation2 + $0x14] sm:$0x33 pattern:$0x76325410] %v1698_v4 }
 0x199   :  { %v1994_v5 = vld [vmem:[#allocation2 + $0x10] sm:$0xff] }
 0x19a   :  { %v2272_v6 = vrot.slane %v1994_v5, %v4822_v21  ;;  %v2265_v7 = vcombine.high %v1994_v5, %v1994_v5 }
 0x19c   :  { %v2280_v8 = vcombine.high %v2272_v6, %v2272_v6  ;;  %v2279_v9 = vrot.slane %v2265_v7, %v4822_v21  ;;  %v2217_v21 = vld [vmem:[%s5376_s3 + $0x6e8] sm:$0xff] }
 0x19e   :  { %2648 = vmatprep.mubr.f32.mxu0 %v2280_v8  ;;  %v2281_v11 = vcombine.high %v2279_v9, %v2279_v9 }
 0x19f   :  { %2649 = vmatmul.mubr.f32.vlgmr.msra.gmra.mxu0 %v2272_v6  ;;  %v3259_v6 = vld [vmem:[%s5377_s4] ss:$0 sm:$0xff]  ;;  %s3884_s4 = smov [#allocation3]  }
 0x1a0   :  { %2718 = vmatprep.mubr.f32.mxu1 %v2281_v11  ;;  %3472 = vmatpush3.msra.mxu0 %v2203_v10  ;;  %s2802_s7 = sshll.u32 %s3884_s4, 4  ;;  %s2803_s7 = int_to_ptr.vmem [resolvable:$true] %s2802_s7 }
 0x1a1   :  { %2719 = vmatmul.mubr.f32.vlgmr.msra.gmra.mxu1 %v2279_v9  ;;  %3473 = vmatprep.subr.mxu0 %v2218_v12  ;;  %s3861_s8 = scalar_lea.vmem %s2803_s7, 32  ;;  %p3866_p1 = scmp.lt.s32.totalorder %s2803_s7, %s2803_s7 }
 0x1a2   :  { %3474 = vmatpush3.msra.mxu0 %v2202_v13  ;;  %p3862_p0 = scmp.ne.s32.totalorder %s2803_s7, %s3861_s8  ;;  %p3867_p2 = scmp.lt.s32.totalorder %s3861_s8, %s3861_s8 }
 0x1a3   :  { %3475 = vmatprep.subr.mxu0 %v2217_v21 }
 0x1a4   :  { %3476 = vmatpush3.msra.mxu0 %v2201_v14  ;;  %p3868_p3 = por %p3867_p2, %p3866_p1 }
 0x1a5   :  { %3477 = vmatprep.subr.mxu0 %v2216_v15 }
 0x1a6   :  { %3478 = vmatpush3.msra.mxu0 %v2200_v16  ;;  %p3869_p4 = pnand %p3868_p3, %p3862_p0 }
 0x1a7   :  { %3479 = vmatprep.subr.mxu0 %v2215_v17 }
 0x1a8   :  { %3480 = vmatpush3.msra.mxu0 %v2199_v20 }
 0x1a9   :  { %3481 = vmatprep.subr.mxu0 %v2214_v24 }
 0x1aa   :  { %3482 = vmatpush3.msra.mxu0 %v2198_v18 }
 0x1ab   :  { %3483 = vmatprep.subr.mxu0 %v2213_v25 }
 0x1ac   :  { %3484 = vmatpush3.msra.mxu0 %v2197_v26 }
 0x1ad   :  { %3485 = vmatprep.subr.mxu0 %v2212_v23 }
 0x1ae   :  { %3486 = vmatpush3.msra.mxu0 %v2196_v28 }
 0x1af   :  { %3487 = vmatprep.subr.mxu0 %v2211_v29 }
 0x1b0   :  { %3488 = vmatpush3.msra.mxu0 %v2195_v30 }
 0x1b1   :  { %3489 = vmatprep.subr.mxu0 %v2210_v31 }
 0x1b2   :  { %3490 = vmatpush3.msra.mxu0 %v2194_v32 }
 0x1b3   :  { %3491 = vmatprep.subr.mxu0 %v2209_v33 }
 0x1b4   :  { %3492 = vmatpush3.msra.mxu0 %v2193_v34 }
 0x1b5   :  { %3493 = vmatprep.subr.mxu0 %v2208_v35 }
 0x1b6   :  { %3494 = vmatpush3.msra.mxu0 %v2192_v36 }
 0x1b7   :  { %3495 = vmatprep.subr.mxu0 %v2207_v22 }
 0x1b8   :  { %3496 = vmatpush3.msra.mxu0 %v2191_v37 }
 0x1b9   :  { %3497 = vmatprep.subr.mxu0 %v2206_v38 }
 0x1ba   :  { %3498 = vmatpush3.msra.mxu0 %v2190_v39 }
 0x1bb   :  { %3499 = vmatprep.subr.mxu0 %v2205_v40 }
 0x1bc   :  { %3500 = vmatpush3.msra.mxu0 %v2189_v41 }
 0x1bd   :  { %3501 = vmatprep.subr.mxu0 %v2204_v42 }
 0x1be   :  { %3502 = vmatpush3.msra.mxu0 %v2188_v43 }
 0x1c2   :  { %v1957_v47 = vpop.f32.mrf.mxu0 }
 0x1c3   :  { %v1958_v48 = vadd.f32 %v1957_v47, %v1749_v45 }
 0x1c4   :  { %v1959_v49 = vpop.f32.mrf.mxu0 }
 0x1c5   :  { %v1964_v50 = vmax.f32 %v1958_v48, 0.0  ;;  %v1960_v51 = vadd.f32 %v1959_v49, %v1753_v46 }
 0x1c6   :  { %v1961_v52 = vpop.f32.mrf.mxu0 }
 0x1c7   :  { %v1968_v53 = vrot.slane %v1964_v50, 2  ;;  %v1965_v54 = vmax.f32 %v1960_v51, 0.0  ;;  %v1974_v58 = vrot.slane %v1964_v50, 4 }
 0x1c8   :  { %v1962_v55 = vpop.f32.mrf.mxu0 }
 0x1c9   :  { %v1972_v56 = vadd.f32 %v1968_v53, %v1964_v50  ;;  %v1969_v57 = vrot.slane %v1965_v54, 2  ;;  %v1975_v60 = vrot.slane %v1965_v54, 4 }
 0x1cb   :  { %v1973_v59 = vadd.f32 %v1969_v57, %v1965_v54  ;;  %v1978_v61 = vadd.f32 %v1974_v58, %v1972_v56 }
 0x1cd   :  { %v1979_v62 = vadd.f32 %v1975_v60, %v1973_v59 }
 0x1cf   :  { %v1982_v63 = vcombine.low %v1978_v61, %v1979_v62 }
 0x1d1   :  { %3258 = vst.sshfl [vmem:[#allocation2 + $0x18] sm:$0x33 pattern:$0x76325410] %v1982_v63 }
 0x1d8   :  { %v3260_v19 = vld.sshfl [vmem:[#allocation2 + $0x18] sm:$0x33 pattern:$0x76325410] }
 0x1d9   :  { %v2289_v27 = vcombine.high %v3260_v19, %v3260_v19 }
 0x1db   :  { %2788 = vmatprep.mubr.f32.mxu0 %v2289_v27 }
 0x1dc   :  { %2789 = vmatmul.mubr.f32.vlgmr.msra.gmra.mxu0 %v3260_v19 }
 0x1df   :  { %v3293_v0 = vpop.f32.mrf.mxu1 }
 0x1e1   :  { %v3294_v1 = vpop.f32.mrf.mxu1 }
 0x1e2   :  { %v3295_v5 = vadd.f32 %v3294_v1, %v3293_v0 }
 0x1e4   :  { %v2371_v11 = vadd.f32 %v3295_v5, %v3259_v6 }
 0x1ff   :  { %v3328_v2 = vpop.f32.mrf.mxu1 }
 0x201   :  { %v3329_v4 = vpop.f32.mrf.mxu1 }
 0x202   :  { %v3330_v9 = vadd.f32 %v3329_v4, %v3328_v2 }
 0x204   :  { %v2441_v21 = vadd.f32 %v3330_v9, %v2371_v11 }
 0x21f   :  { %v3363_v3 = vpop.f32.mrf.mxu0 }
 0x221   :  { %v3364_v7 = vpop.f32.mrf.mxu0  ;;  %v3398_v8 = vpop.f32.mrf.mxu1 }
 0x222   :  { %v3365_v12 = vadd.f32 %v3364_v7, %v3363_v3 }
 0x223   :  { %v3399_v13 = vpop.f32.mrf.mxu1 }
 0x224   :  { %v2511_v16 = vadd.f32 %v3365_v12, %v2441_v21  ;;  %v3400_v17 = vadd.f32 %v3399_v13, %v3398_v8 }
 0x226   :  { %v2581_v18 = vadd.f32 %v3400_v17, %v2511_v16 }
 0x25f   :  { %v3433_v10 = vpop.f32.mrf.mxu0 }
 0x261   :  { %v3434_v14 = vpop.f32.mrf.mxu0  ;;  %v3468_v15 = vpop.f32.mrf.mxu1 }
 0x262   :  { %v3435_v20 = vadd.f32 %v3434_v14, %v3433_v10 }
 0x263   :  { %v3469_v24 = vpop.f32.mrf.mxu1 }
 0x264   :  { %v2651_v25 = vadd.f32 %v3435_v20, %v2581_v18  ;;  %v3470_v26 = vadd.f32 %v3469_v24, %v3468_v15 }
 0x266   :  { %v2721_v29 = vadd.f32 %v3470_v26, %v2651_v25 }
 0x29c   :  { %v3503_v23 = vpop.f32.mrf.mxu0 }
 0x29e   :  { %v3504_v28 = vpop.f32.mrf.mxu0 }
 0x29f   :  { %v3505_v30 = vadd.f32 %v3504_v28, %v3503_v23 }
 0x2a1   :  { %v2791_v31 = vadd.f32 %v3505_v30, %v2721_v29 }
 0x2a3   :  { %2795 = vst.msk [vmem:[#allocation3] sm:$0x3] %vm2794_vm0, %v2791_v31 }
 0x2a4   :  { %3872 = shalt.err (!%p3869_p4)
}
 0x2a5   :  { %2805 = dma.vmem_to_hbm [thread:$0]  %s2803_s7, 32, %s5378_s5, [#allocation4]  }
 0x2a6   :  { %3881 = dma.done.wait [#allocation4], 32  }
 0x2a7   :  { %3882 = vsyncadd [#allocation4], 4294967264 }
 0x2a8   :  { %2809 = vsyncpa [#allocation4], 1 }

</bundles_post_ra>
